<compile_context>
chip_gen: v7x
topology: tpu7x:2x2x1
jax: 0.10.0
libtpu: 0.0.40
codegen_flags: <defaults>
</compile_context>

<pallas_src>
import functools

import numpy as np

import jax
import jax.numpy as jnp
from jax.experimental import pallas as pl
from jax.experimental.pallas import tpu as pltpu


def _proxyless_fused_conv_kernel(*refs, K, W, HW, Cin, Nb, has_mask):
    """SAME KxK conv on Nb images, all K*K taps fused into ONE MXU matmul.

    refs (has_mask=True):  x_ref, w_ref, b_ref, m_ref, o_ref, piece_ref
    refs (has_mask=False): x_ref, w_ref, b_ref,        o_ref, piece_ref

    x_ref:     (Nb, Cin, H*W)      f32   flat spatial on the 128-lane axis
    w_ref:     (Cout, K*K*Cin)     bf16  fused per-tap weights (lane-dense LHS)
    b_ref:     (Cout, 1)           f32   bias
    m_ref:     (K*K, H*W)          bf16  per-tap {0,1} SAME-padding masks
    o_ref:     (Nb, Cout, H*W)     f32   lane-dense output
    piece_ref: (K*K*Cin, Nb*H*W)   bf16  VMEM scratch: fused matmul RHS
    """
    if has_mask:
        x_ref, w_ref, b_ref, m_ref, o_ref, piece_ref = refs
    else:
        x_ref, w_ref, b_ref, o_ref, piece_ref = refs
        m_ref = None
    pad = K // 2

    # --- build the fused (K*K*Cin, Nb*HW) RHS in VMEM ------------------------
    for n in range(Nb):
        x = x_ref[n]                                # (Cin, HW) f32
        x_bf = x.astype(jnp.bfloat16)               # hoisted cast (center tap / 1x1 op)
        for kh in range(K):
            for kw in range(K):
                t = kh * K + kw
                s = (kh - pad) * W + (kw - pad)     # static flat-spatial shift
                if s == 0:
                    # Center tap (and the whole 1x1 candidate): source pixel is
                    # always in-bounds -> no roll, no mask multiply.
                    piece = x_bf
                else:
                    r = (-s) % HW
                    # shifted[ci, p] == x[ci, p + s]; the roll rides the XLU slot.
                    rolled = pltpu.roll(x, r, axis=1) if r else x
                    # {0,1} boundary mask == SAME zero padding, applied in bf16
                    # after the cast (half the vreg traffic of an f32 multiply).
                    # NOTE(v5e): no bf16 VALU there -- keep the mask f32 on that
                    # chip; the fused matmul below is the main win either way.
                    m = m_ref[pl.ds(t, 1), :]       # (1, HW) bf16
                    piece = rolled.astype(jnp.bfloat16) * m
                piece_ref[pl.ds(t * Cin, Cin), pl.ds(n * HW, HW)] = piece

    # --- ONE fused MXU matmul over the K*K*Cin contraction, f32 accumulation --
    acc = jnp.dot(w_ref[...], piece_ref[...],
                  preferred_element_type=jnp.float32)         # (Cout, Nb*HW)
    bias = b_ref[...]                                          # (Cout, 1)
    for n in range(Nb):
        # HW is a multiple of 128 -> unmasked lane-dense stores.
        o_ref[n] = (acc[:, n * HW:(n + 1) * HW] + bias).astype(o_ref.dtype)
    # TODO(synk): when scaling Cin/HW up, tile HW with halos, keep the
    # accumulator in a VMEM scratch initialized under pl.when, and derive tile
    # sizes from v7x's 64 MiB VMEM (set vmem_limit_bytes explicitly).


@functools.lru_cache(maxsize=None)
def _tap_masks(H, W, K):
    """(K*K, H*W) bf16 {0,1} masks: 1 where the tap's source pixel is in-bounds.

    2-D lane-dense layout (not (K*K, 1, HW) f32): avoids per-tap 1->8 sublane
    padding, ~16x less VMEM/DMA.
    """
    pad = K // 2
    hh, ww = np.meshgrid(np.arange(H), np.arange(W), indexing="ij")
    masks = np.zeros((K * K, H * W), np.float32)
    for kh in range(K):
        for kw in range(K):
            dh, dw = kh - pad, kw - pad
            valid = ((hh + dh >= 0) & (hh + dh < H) &
                     (ww + dw >= 0) & (ww + dw < W))
            masks[kh * K + kw, :] = valid.reshape(-1).astype(np.float32)
    return jnp.asarray(masks, dtype=jnp.bfloat16)


def _pick_batch_per_step(N, HW, lane_target=1024):
    """Images packed per grid step: amortize ~0.35us/step and widen the fused
    matmul RHS (Nb*HW lanes), while keeping an integer number of grid steps."""
    nb = max(1, min(N, lane_target // max(HW, 1)))
    while N % nb:
        nb -= 1
    return nb


def conv2d_same_nchw_pallas(x_nchw, w_fused, b_col, K, *, batch_per_step=None):
    """SAME-padded KxK conv, NCHW. x_nchw: (N,Cin,H,W) f32,
    w_fused: (Cout, K*K*Cin) bf16, b_col: (Cout,1) f32 -> (N,Cout,H,W) f32."""
    N, Cin, H, W = x_nchw.shape
    Cout = b_col.shape[0]
    HW = H * W
    Nb = batch_per_step or _pick_batch_per_step(N, HW)
    assert N % Nb == 0
    grid = (N // Nb,)
    x_flat = x_nchw.reshape(N, Cin, HW)   # contiguous reshape; no transpose / pad copy
    has_mask = K > 1                      # 1x1 candidate: no mask operand / DMA at all
    kernel = functools.partial(_proxyless_fused_conv_kernel,
                               K=K, W=W, HW=HW, Cin=Cin, Nb=Nb, has_mask=has_mask)
    in_specs = [
        pl.BlockSpec((Nb, Cin, HW), lambda g: (g, 0, 0)),
        pl.BlockSpec((Cout, K * K * Cin), lambda g: (0, 0)),
        pl.BlockSpec((Cout, 1), lambda g: (0, 0)),
    ]
    args = [x_flat, w_fused, b_col]
    if has_mask:
        in_specs.append(pl.BlockSpec((K * K, HW), lambda g: (0, 0)))
        args.append(_tap_masks(H, W, K))
    out_flat = pl.pallas_call(
        kernel,
        out_shape=jax.ShapeDtypeStruct((N, Cout, HW), jnp.float32),
        grid=grid,
        in_specs=in_specs,
        out_specs=pl.BlockSpec((Nb, Cout, HW), lambda g: (g, 0, 0)),
        scratch_shapes=[pltpu.VMEM((K * K * Cin, Nb * HW), jnp.bfloat16)],
        compiler_params=pltpu.CompilerParams(
            dimension_semantics=("parallel",)),
    )(*args)
    return out_flat.reshape(N, Cout, H, W)


class ProxylessLayerChoice:
    """JAX/Pallas port of nni ProxylessLayerChoice (forward pass)."""

    def __init__(self, op_params, key):
        # op_params: list of (weight (K,K,Cin,Cout), bias (Cout,)) per candidate op.
        # Pack once: fused lane-dense (Cout, K*K*Cin) bf16 weight whose row
        # order (t*Cin + ci, t = kh*K + kw) matches the kernel's piece scratch,
        # plus a (Cout, 1) f32 bias column.
        self.packed_ops = []
        for w, b in op_params:
            K = w.shape[0]
            Cin, Cout = w.shape[2], w.shape[3]
            w_f = jnp.transpose(w, (3, 0, 1, 2)).reshape(Cout, K * K * Cin)
            w_f = w_f.astype(jnp.bfloat16)
            b_c = b.reshape(Cout, 1).astype(jnp.float32)
            self.packed_ops.append((K, w_f, b_c))
        n = len(op_params)
        k_alpha, k_gates = jax.random.split(key)
        # nn.Parameter(torch.randn(n) * 0.001)
        self.alpha = jax.random.normal(k_alpha, (n,), jnp.float32) * 0.001
        self._binary_gates = jax.random.normal(k_gates, (n,), jnp.float32) * 0.001
        self.sampled = None
        self.training = True

    def resample(self, key):
        # probs = softmax(alpha); sample ~ multinomial(probs, 1)
        self.sampled = int(jax.random.categorical(key, self.alpha))
        gates = jnp.zeros_like(self._binary_gates)
        self._binary_gates = gates.at[self.sampled].set(1.0)

    def __call__(self, x_nchw):
        # Training forward == ops[sampled](x); _ArchGradientFunction only alters backward.
        # TODO(synk): binary-gate backward (per-op <out_k, grad_out> sums) and
        # finalize_grad are autograd machinery, not part of the forward pass.
        assert self.training and self.sampled is not None
        K, w_f, b_c = self.packed_ops[self.sampled]
        if x_nchw.dtype != jnp.float32:
            x_nchw = x_nchw.astype(jnp.float32)
        return conv2d_same_nchw_pallas(x_nchw, w_f, b_c, K)

    def export(self):
        return int(jnp.argmax(self.alpha))

    def export_prob(self):
        return jax.nn.softmax(self.alpha, axis=-1)


def _reference_conv_nchw(x_nchw, w, b, K):
    """Pure-JAX reference (lax conv) for correctness check. w: (K,K,Cin,Cout)."""
    pad = K // 2
    y = jax.lax.conv_general_dilated(
        x_nchw.astype(jnp.float32),
        jnp.transpose(w, (3, 2, 0, 1)),  # (Cout, Cin, K, K)
        window_strides=(1, 1),
        padding=((pad, pad), (pad, pad)),
        dimension_numbers=("NCHW", "OIHW", "NCHW"),
    )
    return y + b.reshape(1, -1, 1, 1)


if __name__ == "__main__":
    key = jax.random.PRNGKey(0)
    k_x, k_mod, k_sample, *k_ops = jax.random.split(key, 9)

    N, C, H, W = 2, 4, 16, 16
    x = jax.random.normal(k_x, (N, C, H, W), jnp.float32)

    # Deterministic candidate-op parameters: Conv2d(C, C, k, padding=k//2) for k in (3, 5, 1)
    kernel_sizes = (3, 5, 1)
    op_params = []
    for i, ksz in enumerate(kernel_sizes):
        wkey, bkey = jax.random.split(k_ops[i])
        fan_in = C * ksz * ksz
        bound = 1.0 / (fan_in ** 0.5)  # PyTorch Conv2d default init range
        w = jax.random.uniform(wkey, (ksz, ksz, C, C), jnp.float32, -bound, bound)
        b = jax.random.uniform(bkey, (C,), jnp.float32, -bound, bound)
        op_params.append((w, b))

    layer = ProxylessLayerChoice(op_params, k_mod)
    layer.resample(k_sample)

    out = layer(x)
    out = jax.block_until_ready(out)
    assert out.shape == (N, C, H, W)

    # Verify every candidate path (K=3 / K=5 masked, K=1 mask-less) against a
    # pure-JAX conv reference. bf16 MXU inputs with f32 accumulation -> loose tol.
    for idx, ksz in enumerate(kernel_sizes):
        layer.sampled = idx
        got = jax.block_until_ready(layer(x))
        ref = _reference_conv_nchw(x, *op_params[idx], ksz)
        err = float(jnp.max(jnp.abs(got - ref)))
        assert err < 5e-2, (idx, err)

    print("KERNEL_OK")
</pallas_src>

<mosaic_0001>
module attributes {stable_mosaic.version = 11 : i64} {
  func.func @_proxyless_fused_conv_kernel(%arg0: i32, %arg1: memref<2x4x256xf32, #tpu.memory_space<vmem>>, %arg2: memref<4x100xbf16, #tpu.memory_space<vmem>>, %arg3: memref<4x1xf32, #tpu.memory_space<vmem>>, %arg4: memref<25x256xbf16, #tpu.memory_space<vmem>>, %arg5: memref<2x4x256xf32, #tpu.memory_space<vmem>>, %arg6: memref<100x512xbf16, #tpu.memory_space<vmem>>) attributes {dimension_semantics = [#tpu.dimension_semantics<parallel>], iteration_bounds = array<i64: 1>, scalar_prefetch = 0 : i64, scratch_operands = 1 : i64, tpu.core_type = #tpu.core_type<tc>, window_params = [{transform_indices = @transform_0, window_bounds = array<i64: 2, 4, 256>}, {pipeline_mode = #tpu.pipeline_mode<synchronous>, transform_indices = @transform_1, window_bounds = array<i64: 4, 100>}, {pipeline_mode = #tpu.pipeline_mode<synchronous>, transform_indices = @transform_2, window_bounds = array<i64: 4, 1>}, {pipeline_mode = #tpu.pipeline_mode<synchronous>, transform_indices = @transform_3, window_bounds = array<i64: 25, 256>}, {transform_indices = @transform_4, window_bounds = array<i64: 2, 4, 256>}]} {
    %c0 = arith.constant 0 : index
    %c0_0 = arith.constant 0 : index
    %c0_1 = arith.constant 0 : index
    %0 = vector.load %arg1[%c0, %c0_0, %c0_1] : memref<2x4x256xf32, #tpu.memory_space<vmem>>, vector<1x4x256xf32>
    %1 = vector.shape_cast %0 : vector<1x4x256xf32> to vector<4x256xf32>
    %2 = arith.truncf %1 : vector<4x256xf32> to vector<4x256xbf16>
    %c34_i32 = arith.constant 34 : i32
    %3 = tpu.dynamic_rotate %1 by %c34_i32 dim 1 : vector<4x256xf32>, i32 -> vector<4x256xf32>
    %c0_2 = arith.constant 0 : index
    %c0_3 = arith.constant 0 : index
    %4 = vector.load %arg4[%c0_2, %c0_3] : memref<25x256xbf16, #tpu.memory_space<vmem>>, vector<1x256xbf16>
    %5 = arith.truncf %3 : vector<4x256xf32> to vector<4x256xbf16>
    %6 = vector.broadcast %4 : vector<1x256xbf16> to vector<4x256xbf16>
    %7 = arith.mulf %5, %6 : vector<4x256xbf16>
    %c0_4 = arith.constant 0 : index
    %c0_5 = arith.constant 0 : index
    %8 = vector.load %arg6[%c0_4, %c0_5] : memref<100x512xbf16, #tpu.memory_space<vmem>>, vector<4x256xbf16>
    tpu.vector_store %arg6[%c0_4, %c0_5], %7 {strides = array<i32>} : memref<100x512xbf16, #tpu.memory_space<vmem>>, vector<4x256xbf16>,
    %c33_i32 = arith.constant 33 : i32
    %9 = tpu.dynamic_rotate %1 by %c33_i32 dim 1 : vector<4x256xf32>, i32 -> vector<4x256xf32>
    %c1 = arith.constant 1 : index
    %c0_6 = arith.constant 0 : index
    %10 = vector.load %arg4[%c1, %c0_6] : memref<25x256xbf16, #tpu.memory_space<vmem>>, vector<1x256xbf16>
    %11 = arith.truncf %9 : vector<4x256xf32> to vector<4x256xbf16>
    %12 = vector.broadcast %10 : vector<1x256xbf16> to vector<4x256xbf16>
    %13 = arith.mulf %11, %12 : vector<4x256xbf16>
    %c4 = arith.constant 4 : index
    %c0_7 = arith.constant 0 : index
    %14 = vector.load %arg6[%c4, %c0_7] : memref<100x512xbf16, #tpu.memory_space<vmem>>, vector<4x256xbf16>
    tpu.vector_store %arg6[%c4, %c0_7], %13 {strides = array<i32>} : memref<100x512xbf16, #tpu.memory_space<vmem>>, vector<4x256xbf16>,
    %c32_i32 = arith.constant 32 : i32
    %15 = tpu.dynamic_rotate %1 by %c32_i32 dim 1 : vector<4x256xf32>, i32 -> vector<4x256xf32>
    %c2 = arith.constant 2 : index
    %c0_8 = arith.constant 0 : index
    %16 = vector.load %arg4[%c2, %c0_8] : memref<25x256xbf16, #tpu.memory_space<vmem>>, vector<1x256xbf16>
    %17 = arith.truncf %15 : vector<4x256xf32> to vector<4x256xbf16>
    %18 = vector.broadcast %16 : vector<1x256xbf16> to vector<4x256xbf16>
    %19 = arith.mulf %17, %18 : vector<4x256xbf16>
    %c8 = arith.constant 8 : index
    %c0_9 = arith.constant 0 : index
    %20 = vector.load %arg6[%c8, %c0_9] : memref<100x512xbf16, #tpu.memory_space<vmem>>, vector<4x256xbf16>
    tpu.vector_store %arg6[%c8, %c0_9], %19 {strides = array<i32>} : memref<100x512xbf16, #tpu.memory_space<vmem>>, vector<4x256xbf16>,
    %c31_i32 = arith.constant 31 : i32
    %21 = tpu.dynamic_rotate %1 by %c31_i32 dim 1 : vector<4x256xf32>, i32 -> vector<4x256xf32>
    %c3 = arith.constant 3 : index
    %c0_10 = arith.constant 0 : index
    %22 = vector.load %arg4[%c3, %c0_10] : memref<25x256xbf16, #tpu.memory_space<vmem>>, vector<1x256xbf16>
    %23 = arith.truncf %21 : vector<4x256xf32> to vector<4x256xbf16>
    %24 = vector.broadcast %22 : vector<1x256xbf16> to vector<4x256xbf16>
    %25 = arith.mulf %23, %24 : vector<4x256xbf16>
    %c12 = arith.constant 12 : index
    %c0_11 = arith.constant 0 : index
    %26 = vector.load %arg6[%c12, %c0_11] : memref<100x512xbf16, #tpu.memory_space<vmem>>, vector<4x256xbf16>
    tpu.vector_store %arg6[%c12, %c0_11], %25 {strides = array<i32>} : memref<100x512xbf16, #tpu.memory_space<vmem>>, vector<4x256xbf16>,
    %c30_i32 = arith.constant 30 : i32
    %27 = tpu.dynamic_rotate %1 by %c30_i32 dim 1 : vector<4x256xf32>, i32 -> vector<4x256xf32>
    %c4_12 = arith.constant 4 : index
    %c0_13 = arith.constant 0 : index
    %28 = vector.load %arg4[%c4_12, %c0_13] : memref<25x256xbf16, #tpu.memory_space<vmem>>, vector<1x256xbf16>
    %29 = arith.truncf %27 : vector<4x256xf32> to vector<4x256xbf16>
    %30 = vector.broadcast %28 : vector<1x256xbf16> to vector<4x256xbf16>
    %31 = arith.mulf %29, %30 : vector<4x256xbf16>
    %c16 = arith.constant 16 : index
    %c0_14 = arith.constant 0 : index
    %32 = vector.load %arg6[%c16, %c0_14] : memref<100x512xbf16, #tpu.memory_space<vmem>>, vector<4x256xbf16>
    tpu.vector_store %arg6[%c16, %c0_14], %31 {strides = array<i32>} : memref<100x512xbf16, #tpu.memory_space<vmem>>, vector<4x256xbf16>,
    %c18_i32 = arith.constant 18 : i32
    %33 = tpu.dynamic_rotate %1 by %c18_i32 dim 1 : vector<4x256xf32>, i32 -> vector<4x256xf32>
    %c5 = arith.constant 5 : index
    %c0_15 = arith.constant 0 : index
    %34 = vector.load %arg4[%c5, %c0_15] : memref<25x256xbf16, #tpu.memory_space<vmem>>, vector<1x256xbf16>
    %35 = arith.truncf %33 : vector<4x256xf32> to vector<4x256xbf16>
    %36 = vector.broadcast %34 : vector<1x256xbf16> to vector<4x256xbf16>
    %37 = arith.mulf %35, %36 : vector<4x256xbf16>
    %c20 = arith.constant 20 : index
    %c0_16 = arith.constant 0 : index
    %38 = vector.load %arg6[%c20, %c0_16] : memref<100x512xbf16, #tpu.memory_space<vmem>>, vector<4x256xbf16>
    tpu.vector_store %arg6[%c20, %c0_16], %37 {strides = array<i32>} : memref<100x512xbf16, #tpu.memory_space<vmem>>, vector<4x256xbf16>,
    %c17_i32 = arith.constant 17 : i32
    %39 = tpu.dynamic_rotate %1 by %c17_i32 dim 1 : vector<4x256xf32>, i32 -> vector<4x256xf32>
    %c6 = arith.constant 6 : index
    %c0_17 = arith.constant 0 : index
    %40 = vector.load %arg4[%c6, %c0_17] : memref<25x256xbf16, #tpu.memory_space<vmem>>, vector<1x256xbf16>
    %41 = arith.truncf %39 : vector<4x256xf32> to vector<4x256xbf16>
    %42 = vector.broadcast %40 : vector<1x256xbf16> to vector<4x256xbf16>
    %43 = arith.mulf %41, %42 : vector<4x256xbf16>
    %c24 = arith.constant 24 : index
    %c0_18 = arith.constant 0 : index
    %44 = vector.load %arg6[%c24, %c0_18] : memref<100x512xbf16, #tpu.memory_space<vmem>>, vector<4x256xbf16>
    tpu.vector_store %arg6[%c24, %c0_18], %43 {strides = array<i32>} : memref<100x512xbf16, #tpu.memory_space<vmem>>, vector<4x256xbf16>,
    %c16_i32 = arith.constant 16 : i32
    %45 = tpu.dynamic_rotate %1 by %c16_i32 dim 1 : vector<4x256xf32>, i32 -> vector<4x256xf32>
    %c7 = arith.constant 7 : index
    %c0_19 = arith.constant 0 : index
    %46 = vector.load %arg4[%c7, %c0_19] : memref<25x256xbf16, #tpu.memory_space<vmem>>, vector<1x256xbf16>
    %47 = arith.truncf %45 : vector<4x256xf32> to vector<4x256xbf16>
    %48 = vector.broadcast %46 : vector<1x256xbf16> to vector<4x256xbf16>
    %49 = arith.mulf %47, %48 : vector<4x256xbf16>
    %c28 = arith.constant 28 : index
    %c0_20 = arith.constant 0 : index
    %50 = vector.load %arg6[%c28, %c0_20] : memref<100x512xbf16, #tpu.memory_space<vmem>>, vector<4x256xbf16>
    tpu.vector_store %arg6[%c28, %c0_20], %49 {strides = array<i32>} : memref<100x512xbf16, #tpu.memory_space<vmem>>, vector<4x256xbf16>,
    %c15_i32 = arith.constant 15 : i32
    %51 = tpu.dynamic_rotate %1 by %c15_i32 dim 1 : vector<4x256xf32>, i32 -> vector<4x256xf32>
    %c8_21 = arith.constant 8 : index
    %c0_22 = arith.constant 0 : index
    %52 = vector.load %arg4[%c8_21, %c0_22] : memref<25x256xbf16, #tpu.memory_space<vmem>>, vector<1x256xbf16>
    %53 = arith.truncf %51 : vector<4x256xf32> to vector<4x256xbf16>
    %54 = vector.broadcast %52 : vector<1x256xbf16> to vector<4x256xbf16>
    %55 = arith.mulf %53, %54 : vector<4x256xbf16>
    %c32 = arith.constant 32 : index
    %c0_23 = arith.constant 0 : index
    %56 = vector.load %arg6[%c32, %c0_23] : memref<100x512xbf16, #tpu.memory_space<vmem>>, vector<4x256xbf16>
    tpu.vector_store %arg6[%c32, %c0_23], %55 {strides = array<i32>} : memref<100x512xbf16, #tpu.memory_space<vmem>>, vector<4x256xbf16>,
    %c14_i32 = arith.constant 14 : i32
    %57 = tpu.dynamic_rotate %1 by %c14_i32 dim 1 : vector<4x256xf32>, i32 -> vector<4x256xf32>
    %c9 = arith.constant 9 : index
    %c0_24 = arith.constant 0 : index
    %58 = vector.load %arg4[%c9, %c0_24] : memref<25x256xbf16, #tpu.memory_space<vmem>>, vector<1x256xbf16>
    %59 = arith.truncf %57 : vector<4x256xf32> to vector<4x256xbf16>
    %60 = vector.broadcast %58 : vector<1x256xbf16> to vector<4x256xbf16>
    %61 = arith.mulf %59, %60 : vector<4x256xbf16>
    %c36 = arith.constant 36 : index
    %c0_25 = arith.constant 0 : index
    %62 = vector.load %arg6[%c36, %c0_25] : memref<100x512xbf16, #tpu.memory_space<vmem>>, vector<4x256xbf16>
    tpu.vector_store %arg6[%c36, %c0_25], %61 {strides = array<i32>} : memref<100x512xbf16, #tpu.memory_space<vmem>>, vector<4x256xbf16>,
    %c2_i32 = arith.constant 2 : i32
    %63 = tpu.dynamic_rotate %1 by %c2_i32 dim 1 : vector<4x256xf32>, i32 -> vector<4x256xf32>
    %c10 = arith.constant 10 : index
    %c0_26 = arith.constant 0 : index
    %64 = vector.load %arg4[%c10, %c0_26] : memref<25x256xbf16, #tpu.memory_space<vmem>>, vector<1x256xbf16>
    %65 = arith.truncf %63 : vector<4x256xf32> to vector<4x256xbf16>
    %66 = vector.broadcast %64 : vector<1x256xbf16> to vector<4x256xbf16>
    %67 = arith.mulf %65, %66 : vector<4x256xbf16>
    %c40 = arith.constant 40 : index
    %c0_27 = arith.constant 0 : index
    %68 = vector.load %arg6[%c40, %c0_27] : memref<100x512xbf16, #tpu.memory_space<vmem>>, vector<4x256xbf16>
    tpu.vector_store %arg6[%c40, %c0_27], %67 {strides = array<i32>} : memref<100x512xbf16, #tpu.memory_space<vmem>>, vector<4x256xbf16>,
    %c1_i32 = arith.constant 1 : i32
    %69 = tpu.dynamic_rotate %1 by %c1_i32 dim 1 : vector<4x256xf32>, i32 -> vector<4x256xf32>
    %c11 = arith.constant 11 : index
    %c0_28 = arith.constant 0 : index
    %70 = vector.load %arg4[%c11, %c0_28] : memref<25x256xbf16, #tpu.memory_space<vmem>>, vector<1x256xbf16>
    %71 = arith.truncf %69 : vector<4x256xf32> to vector<4x256xbf16>
    %72 = vector.broadcast %70 : vector<1x256xbf16> to vector<4x256xbf16>
    %73 = arith.mulf %71, %72 : vector<4x256xbf16>
    %c44 = arith.constant 44 : index
    %c0_29 = arith.constant 0 : index
    %74 = vector.load %arg6[%c44, %c0_29] : memref<100x512xbf16, #tpu.memory_space<vmem>>, vector<4x256xbf16>
    tpu.vector_store %arg6[%c44, %c0_29], %73 {strides = array<i32>} : memref<100x512xbf16, #tpu.memory_space<vmem>>, vector<4x256xbf16>,
    %c48 = arith.constant 48 : index
    %c0_30 = arith.constant 0 : index
    %75 = vector.load %arg6[%c48, %c0_30] : memref<100x512xbf16, #tpu.memory_space<vmem>>, vector<4x256xbf16>
    tpu.vector_store %arg6[%c48, %c0_30], %2 {strides = array<i32>} : memref<100x512xbf16, #tpu.memory_space<vmem>>, vector<4x256xbf16>,
    %c255_i32 = arith.constant 255 : i32
    %76 = tpu.dynamic_rotate %1 by %c255_i32 dim 1 : vector<4x256xf32>, i32 -> vector<4x256xf32>
    %c13 = arith.constant 13 : index
    %c0_31 = arith.constant 0 : index
    %77 = vector.load %arg4[%c13, %c0_31] : memref<25x256xbf16, #tpu.memory_space<vmem>>, vector<1x256xbf16>
    %78 = arith.truncf %76 : vector<4x256xf32> to vector<4x256xbf16>
    %79 = vector.broadcast %77 : vector<1x256xbf16> to vector<4x256xbf16>
    %80 = arith.mulf %78, %79 : vector<4x256xbf16>
    %c52 = arith.constant 52 : index
    %c0_32 = arith.constant 0 : index
    %81 = vector.load %arg6[%c52, %c0_32] : memref<100x512xbf16, #tpu.memory_space<vmem>>, vector<4x256xbf16>
    tpu.vector_store %arg6[%c52, %c0_32], %80 {strides = array<i32>} : memref<100x512xbf16, #tpu.memory_space<vmem>>, vector<4x256xbf16>,
    %c254_i32 = arith.constant 254 : i32
    %82 = tpu.dynamic_rotate %1 by %c254_i32 dim 1 : vector<4x256xf32>, i32 -> vector<4x256xf32>
    %c14 = arith.constant 14 : index
    %c0_33 = arith.constant 0 : index
    %83 = vector.load %arg4[%c14, %c0_33] : memref<25x256xbf16, #tpu.memory_space<vmem>>, vector<1x256xbf16>
    %84 = arith.truncf %82 : vector<4x256xf32> to vector<4x256xbf16>
    %85 = vector.broadcast %83 : vector<1x256xbf16> to vector<4x256xbf16>
    %86 = arith.mulf %84, %85 : vector<4x256xbf16>
    %c56 = arith.constant 56 : index
    %c0_34 = arith.constant 0 : index
    %87 = vector.load %arg6[%c56, %c0_34] : memref<100x512xbf16, #tpu.memory_space<vmem>>, vector<4x256xbf16>
    tpu.vector_store %arg6[%c56, %c0_34], %86 {strides = array<i32>} : memref<100x512xbf16, #tpu.memory_space<vmem>>, vector<4x256xbf16>,
    %c242_i32 = arith.constant 242 : i32
    %88 = tpu.dynamic_rotate %1 by %c242_i32 dim 1 : vector<4x256xf32>, i32 -> vector<4x256xf32>
    %c15 = arith.constant 15 : index
    %c0_35 = arith.constant 0 : index
    %89 = vector.load %arg4[%c15, %c0_35] : memref<25x256xbf16, #tpu.memory_space<vmem>>, vector<1x256xbf16>
    %90 = arith.truncf %88 : vector<4x256xf32> to vector<4x256xbf16>
    %91 = vector.broadcast %89 : vector<1x256xbf16> to vector<4x256xbf16>
    %92 = arith.mulf %90, %91 : vector<4x256xbf16>
    %c60 = arith.constant 60 : index
    %c0_36 = arith.constant 0 : index
    %93 = vector.load %arg6[%c60, %c0_36] : memref<100x512xbf16, #tpu.memory_space<vmem>>, vector<4x256xbf16>
    tpu.vector_store %arg6[%c60, %c0_36], %92 {strides = array<i32>} : memref<100x512xbf16, #tpu.memory_space<vmem>>, vector<4x256xbf16>,
    %c241_i32 = arith.constant 241 : i32
    %94 = tpu.dynamic_rotate %1 by %c241_i32 dim 1 : vector<4x256xf32>, i32 -> vector<4x256xf32>
    %c16_37 = arith.constant 16 : index
    %c0_38 = arith.constant 0 : index
    %95 = vector.load %arg4[%c16_37, %c0_38] : memref<25x256xbf16, #tpu.memory_space<vmem>>, vector<1x256xbf16>
    %96 = arith.truncf %94 : vector<4x256xf32> to vector<4x256xbf16>
    %97 = vector.broadcast %95 : vector<1x256xbf16> to vector<4x256xbf16>
    %98 = arith.mulf %96, %97 : vector<4x256xbf16>
    %c64 = arith.constant 64 : index
    %c0_39 = arith.constant 0 : index
    %99 = vector.load %arg6[%c64, %c0_39] : memref<100x512xbf16, #tpu.memory_space<vmem>>, vector<4x256xbf16>
    tpu.vector_store %arg6[%c64, %c0_39], %98 {strides = array<i32>} : memref<100x512xbf16, #tpu.memory_space<vmem>>, vector<4x256xbf16>,
    %c240_i32 = arith.constant 240 : i32
    %100 = tpu.dynamic_rotate %1 by %c240_i32 dim 1 : vector<4x256xf32>, i32 -> vector<4x256xf32>
    %c17 = arith.constant 17 : index
    %c0_40 = arith.constant 0 : index
    %101 = vector.load %arg4[%c17, %c0_40] : memref<25x256xbf16, #tpu.memory_space<vmem>>, vector<1x256xbf16>
    %102 = arith.truncf %100 : vector<4x256xf32> to vector<4x256xbf16>
    %103 = vector.broadcast %101 : vector<1x256xbf16> to vector<4x256xbf16>
    %104 = arith.mulf %102, %103 : vector<4x256xbf16>
    %c68 = arith.constant 68 : index
    %c0_41 = arith.constant 0 : index
    %105 = vector.load %arg6[%c68, %c0_41] : memref<100x512xbf16, #tpu.memory_space<vmem>>, vector<4x256xbf16>
    tpu.vector_store %arg6[%c68, %c0_41], %104 {strides = array<i32>} : memref<100x512xbf16, #tpu.memory_space<vmem>>, vector<4x256xbf16>,
    %c239_i32 = arith.constant 239 : i32
    %106 = tpu.dynamic_rotate %1 by %c239_i32 dim 1 : vector<4x256xf32>, i32 -> vector<4x256xf32>
    %c18 = arith.constant 18 : index
    %c0_42 = arith.constant 0 : index
    %107 = vector.load %arg4[%c18, %c0_42] : memref<25x256xbf16, #tpu.memory_space<vmem>>, vector<1x256xbf16>
    %108 = arith.truncf %106 : vector<4x256xf32> to vector<4x256xbf16>
    %109 = vector.broadcast %107 : vector<1x256xbf16> to vector<4x256xbf16>
    %110 = arith.mulf %108, %109 : vector<4x256xbf16>
    %c72 = arith.constant 72 : index
    %c0_43 = arith.constant 0 : index
    %111 = vector.load %arg6[%c72, %c0_43] : memref<100x512xbf16, #tpu.memory_space<vmem>>, vector<4x256xbf16>
    tpu.vector_store %arg6[%c72, %c0_43], %110 {strides = array<i32>} : memref<100x512xbf16, #tpu.memory_space<vmem>>, vector<4x256xbf16>,
    %c238_i32 = arith.constant 238 : i32
    %112 = tpu.dynamic_rotate %1 by %c238_i32 dim 1 : vector<4x256xf32>, i32 -> vector<4x256xf32>
    %c19 = arith.constant 19 : index
    %c0_44 = arith.constant 0 : index
    %113 = vector.load %arg4[%c19, %c0_44] : memref<25x256xbf16, #tpu.memory_space<vmem>>, vector<1x256xbf16>
    %114 = arith.truncf %112 : vector<4x256xf32> to vector<4x256xbf16>
    %115 = vector.broadcast %113 : vector<1x256xbf16> to vector<4x256xbf16>
    %116 = arith.mulf %114, %115 : vector<4x256xbf16>
    %c76 = arith.constant 76 : index
    %c0_45 = arith.constant 0 : index
    %117 = vector.load %arg6[%c76, %c0_45] : memref<100x512xbf16, #tpu.memory_space<vmem>>, vector<4x256xbf16>
    tpu.vector_store %arg6[%c76, %c0_45], %116 {strides = array<i32>} : memref<100x512xbf16, #tpu.memory_space<vmem>>, vector<4x256xbf16>,
    %c226_i32 = arith.constant 226 : i32
    %118 = tpu.dynamic_rotate %1 by %c226_i32 dim 1 : vector<4x256xf32>, i32 -> vector<4x256xf32>
    %c20_46 = arith.constant 20 : index
    %c0_47 = arith.constant 0 : index
    %119 = vector.load %arg4[%c20_46, %c0_47] : memref<25x256xbf16, #tpu.memory_space<vmem>>, vector<1x256xbf16>
    %120 = arith.truncf %118 : vector<4x256xf32> to vector<4x256xbf16>
    %121 = vector.broadcast %119 : vector<1x256xbf16> to vector<4x256xbf16>
    %122 = arith.mulf %120, %121 : vector<4x256xbf16>
    %c80 = arith.constant 80 : index
    %c0_48 = arith.constant 0 : index
    %123 = vector.load %arg6[%c80, %c0_48] : memref<100x512xbf16, #tpu.memory_space<vmem>>, vector<4x256xbf16>
    tpu.vector_store %arg6[%c80, %c0_48], %122 {strides = array<i32>} : memref<100x512xbf16, #tpu.memory_space<vmem>>, vector<4x256xbf16>,
    %c225_i32 = arith.constant 225 : i32
    %124 = tpu.dynamic_rotate %1 by %c225_i32 dim 1 : vector<4x256xf32>, i32 -> vector<4x256xf32>
    %c21 = arith.constant 21 : index
    %c0_49 = arith.constant 0 : index
    %125 = vector.load %arg4[%c21, %c0_49] : memref<25x256xbf16, #tpu.memory_space<vmem>>, vector<1x256xbf16>
    %126 = arith.truncf %124 : vector<4x256xf32> to vector<4x256xbf16>
    %127 = vector.broadcast %125 : vector<1x256xbf16> to vector<4x256xbf16>
    %128 = arith.mulf %126, %127 : vector<4x256xbf16>
    %c84 = arith.constant 84 : index
    %c0_50 = arith.constant 0 : index
    %129 = vector.load %arg6[%c84, %c0_50] : memref<100x512xbf16, #tpu.memory_space<vmem>>, vector<4x256xbf16>
    tpu.vector_store %arg6[%c84, %c0_50], %128 {strides = array<i32>} : memref<100x512xbf16, #tpu.memory_space<vmem>>, vector<4x256xbf16>,
    %c224_i32 = arith.constant 224 : i32
    %130 = tpu.dynamic_rotate %1 by %c224_i32 dim 1 : vector<4x256xf32>, i32 -> vector<4x256xf32>
    %c22 = arith.constant 22 : index
    %c0_51 = arith.constant 0 : index
    %131 = vector.load %arg4[%c22, %c0_51] : memref<25x256xbf16, #tpu.memory_space<vmem>>, vector<1x256xbf16>
    %132 = arith.truncf %130 : vector<4x256xf32> to vector<4x256xbf16>
    %133 = vector.broadcast %131 : vector<1x256xbf16> to vector<4x256xbf16>
    %134 = arith.mulf %132, %133 : vector<4x256xbf16>
    %c88 = arith.constant 88 : index
    %c0_52 = arith.constant 0 : index
    %135 = vector.load %arg6[%c88, %c0_52] : memref<100x512xbf16, #tpu.memory_space<vmem>>, vector<4x256xbf16>
    tpu.vector_store %arg6[%c88, %c0_52], %134 {strides = array<i32>} : memref<100x512xbf16, #tpu.memory_space<vmem>>, vector<4x256xbf16>,
    %c223_i32 = arith.constant 223 : i32
    %136 = tpu.dynamic_rotate %1 by %c223_i32 dim 1 : vector<4x256xf32>, i32 -> vector<4x256xf32>
    %c23 = arith.constant 23 : index
    %c0_53 = arith.constant 0 : index
    %137 = vector.load %arg4[%c23, %c0_53] : memref<25x256xbf16, #tpu.memory_space<vmem>>, vector<1x256xbf16>
    %138 = arith.truncf %136 : vector<4x256xf32> to vector<4x256xbf16>
    %139 = vector.broadcast %137 : vector<1x256xbf16> to vector<4x256xbf16>
    %140 = arith.mulf %138, %139 : vector<4x256xbf16>
    %c92 = arith.constant 92 : index
    %c0_54 = arith.constant 0 : index
    %141 = vector.load %arg6[%c92, %c0_54] : memref<100x512xbf16, #tpu.memory_space<vmem>>, vector<4x256xbf16>
    tpu.vector_store %arg6[%c92, %c0_54], %140 {strides = array<i32>} : memref<100x512xbf16, #tpu.memory_space<vmem>>, vector<4x256xbf16>,
    %c222_i32 = arith.constant 222 : i32
    %142 = tpu.dynamic_rotate %1 by %c222_i32 dim 1 : vector<4x256xf32>, i32 -> vector<4x256xf32>
    %c24_55 = arith.constant 24 : index
    %c0_56 = arith.constant 0 : index
    %143 = vector.load %arg4[%c24_55, %c0_56] : memref<25x256xbf16, #tpu.memory_space<vmem>>, vector<1x256xbf16>
    %144 = arith.truncf %142 : vector<4x256xf32> to vector<4x256xbf16>
    %145 = vector.broadcast %143 : vector<1x256xbf16> to vector<4x256xbf16>
    %146 = arith.mulf %144, %145 : vector<4x256xbf16>
    %c96 = arith.constant 96 : index
    %c0_57 = arith.constant 0 : index
    %147 = vector.load %arg6[%c96, %c0_57] : memref<100x512xbf16, #tpu.memory_space<vmem>>, vector<4x256xbf16>
    tpu.vector_store %arg6[%c96, %c0_57], %146 {strides = array<i32>} : memref<100x512xbf16, #tpu.memory_space<vmem>>, vector<4x256xbf16>,
    %c1_58 = arith.constant 1 : index
    %c0_59 = arith.constant 0 : index
    %c0_60 = arith.constant 0 : index
    %148 = vector.load %arg1[%c1_58, %c0_59, %c0_60] : memref<2x4x256xf32, #tpu.memory_space<vmem>>, vector<1x4x256xf32>
    %149 = vector.shape_cast %148 : vector<1x4x256xf32> to vector<4x256xf32>
    %150 = arith.truncf %149 : vector<4x256xf32> to vector<4x256xbf16>
    %c34_i32_61 = arith.constant 34 : i32
    %151 = tpu.dynamic_rotate %149 by %c34_i32_61 dim 1 : vector<4x256xf32>, i32 -> vector<4x256xf32>
    %c0_62 = arith.constant 0 : index
    %c0_63 = arith.constant 0 : index
    %152 = vector.load %arg4[%c0_62, %c0_63] : memref<25x256xbf16, #tpu.memory_space<vmem>>, vector<1x256xbf16>
    %153 = arith.truncf %151 : vector<4x256xf32> to vector<4x256xbf16>
    %154 = vector.broadcast %152 : vector<1x256xbf16> to vector<4x256xbf16>
    %155 = arith.mulf %153, %154 : vector<4x256xbf16>
    %c0_64 = arith.constant 0 : index
    %c256 = arith.constant 256 : index
    %156 = vector.load %arg6[%c0_64, %c256] : memref<100x512xbf16, #tpu.memory_space<vmem>>, vector<4x256xbf16>
    tpu.vector_store %arg6[%c0_64, %c256], %155 {strides = array<i32>} : memref<100x512xbf16, #tpu.memory_space<vmem>>, vector<4x256xbf16>,
    %c33_i32_65 = arith.constant 33 : i32
    %157 = tpu.dynamic_rotate %149 by %c33_i32_65 dim 1 : vector<4x256xf32>, i32 -> vector<4x256xf32>
    %c1_66 = arith.constant 1 : index
    %c0_67 = arith.constant 0 : index
    %158 = vector.load %arg4[%c1_66, %c0_67] : memref<25x256xbf16, #tpu.memory_space<vmem>>, vector<1x256xbf16>
    %159 = arith.truncf %157 : vector<4x256xf32> to vector<4x256xbf16>
    %160 = vector.broadcast %158 : vector<1x256xbf16> to vector<4x256xbf16>
    %161 = arith.mulf %159, %160 : vector<4x256xbf16>
    %c4_68 = arith.constant 4 : index
    %c256_69 = arith.constant 256 : index
    %162 = vector.load %arg6[%c4_68, %c256_69] : memref<100x512xbf16, #tpu.memory_space<vmem>>, vector<4x256xbf16>
    tpu.vector_store %arg6[%c4_68, %c256_69], %161 {strides = array<i32>} : memref<100x512xbf16, #tpu.memory_space<vmem>>, vector<4x256xbf16>,
    %c32_i32_70 = arith.constant 32 : i32
    %163 = tpu.dynamic_rotate %149 by %c32_i32_70 dim 1 : vector<4x256xf32>, i32 -> vector<4x256xf32>
    %c2_71 = arith.constant 2 : index
    %c0_72 = arith.constant 0 : index
    %164 = vector.load %arg4[%c2_71, %c0_72] : memref<25x256xbf16, #tpu.memory_space<vmem>>, vector<1x256xbf16>
    %165 = arith.truncf %163 : vector<4x256xf32> to vector<4x256xbf16>
    %166 = vector.broadcast %164 : vector<1x256xbf16> to vector<4x256xbf16>
    %167 = arith.mulf %165, %166 : vector<4x256xbf16>
    %c8_73 = arith.constant 8 : index
    %c256_74 = arith.constant 256 : index
    %168 = vector.load %arg6[%c8_73, %c256_74] : memref<100x512xbf16, #tpu.memory_space<vmem>>, vector<4x256xbf16>
    tpu.vector_store %arg6[%c8_73, %c256_74], %167 {strides = array<i32>} : memref<100x512xbf16, #tpu.memory_space<vmem>>, vector<4x256xbf16>,
    %c31_i32_75 = arith.constant 31 : i32
    %169 = tpu.dynamic_rotate %149 by %c31_i32_75 dim 1 : vector<4x256xf32>, i32 -> vector<4x256xf32>
    %c3_76 = arith.constant 3 : index
    %c0_77 = arith.constant 0 : index
    %170 = vector.load %arg4[%c3_76, %c0_77] : memref<25x256xbf16, #tpu.memory_space<vmem>>, vector<1x256xbf16>
    %171 = arith.truncf %169 : vector<4x256xf32> to vector<4x256xbf16>
    %172 = vector.broadcast %170 : vector<1x256xbf16> to vector<4x256xbf16>
    %173 = arith.mulf %171, %172 : vector<4x256xbf16>
    %c12_78 = arith.constant 12 : index
    %c256_79 = arith.constant 256 : index
    %174 = vector.load %arg6[%c12_78, %c256_79] : memref<100x512xbf16, #tpu.memory_space<vmem>>, vector<4x256xbf16>
    tpu.vector_store %arg6[%c12_78, %c256_79], %173 {strides = array<i32>} : memref<100x512xbf16, #tpu.memory_space<vmem>>, vector<4x256xbf16>,
    %c30_i32_80 = arith.constant 30 : i32
    %175 = tpu.dynamic_rotate %149 by %c30_i32_80 dim 1 : vector<4x256xf32>, i32 -> vector<4x256xf32>
    %c4_81 = arith.constant 4 : index
    %c0_82 = arith.constant 0 : index
    %176 = vector.load %arg4[%c4_81, %c0_82] : memref<25x256xbf16, #tpu.memory_space<vmem>>, vector<1x256xbf16>
    %177 = arith.truncf %175 : vector<4x256xf32> to vector<4x256xbf16>
    %178 = vector.broadcast %176 : vector<1x256xbf16> to vector<4x256xbf16>
    %179 = arith.mulf %177, %178 : vector<4x256xbf16>
    %c16_83 = arith.constant 16 : index
    %c256_84 = arith.constant 256 : index
    %180 = vector.load %arg6[%c16_83, %c256_84] : memref<100x512xbf16, #tpu.memory_space<vmem>>, vector<4x256xbf16>
    tpu.vector_store %arg6[%c16_83, %c256_84], %179 {strides = array<i32>} : memref<100x512xbf16, #tpu.memory_space<vmem>>, vector<4x256xbf16>,
    %c18_i32_85 = arith.constant 18 : i32
    %181 = tpu.dynamic_rotate %149 by %c18_i32_85 dim 1 : vector<4x256xf32>, i32 -> vector<4x256xf32>
    %c5_86 = arith.constant 5 : index
    %c0_87 = arith.constant 0 : index
    %182 = vector.load %arg4[%c5_86, %c0_87] : memref<25x256xbf16, #tpu.memory_space<vmem>>, vector<1x256xbf16>
    %183 = arith.truncf %181 : vector<4x256xf32> to vector<4x256xbf16>
    %184 = vector.broadcast %182 : vector<1x256xbf16> to vector<4x256xbf16>
    %185 = arith.mulf %183, %184 : vector<4x256xbf16>
    %c20_88 = arith.constant 20 : index
    %c256_89 = arith.constant 256 : index
    %186 = vector.load %arg6[%c20_88, %c256_89] : memref<100x512xbf16, #tpu.memory_space<vmem>>, vector<4x256xbf16>
    tpu.vector_store %arg6[%c20_88, %c256_89], %185 {strides = array<i32>} : memref<100x512xbf16, #tpu.memory_space<vmem>>, vector<4x256xbf16>,
    %c17_i32_90 = arith.constant 17 : i32
    %187 = tpu.dynamic_rotate %149 by %c17_i32_90 dim 1 : vector<4x256xf32>, i32 -> vector<4x256xf32>
    %c6_91 = arith.constant 6 : index
    %c0_92 = arith.constant 0 : index
    %188 = vector.load %arg4[%c6_91, %c0_92] : memref<25x256xbf16, #tpu.memory_space<vmem>>, vector<1x256xbf16>
    %189 = arith.truncf %187 : vector<4x256xf32> to vector<4x256xbf16>
    %190 = vector.broadcast %188 : vector<1x256xbf16> to vector<4x256xbf16>
    %191 = arith.mulf %189, %190 : vector<4x256xbf16>
    %c24_93 = arith.constant 24 : index
    %c256_94 = arith.constant 256 : index
    %192 = vector.load %arg6[%c24_93, %c256_94] : memref<100x512xbf16, #tpu.memory_space<vmem>>, vector<4x256xbf16>
    tpu.vector_store %arg6[%c24_93, %c256_94], %191 {strides = array<i32>} : memref<100x512xbf16, #tpu.memory_space<vmem>>, vector<4x256xbf16>,
    %c16_i32_95 = arith.constant 16 : i32
    %193 = tpu.dynamic_rotate %149 by %c16_i32_95 dim 1 : vector<4x256xf32>, i32 -> vector<4x256xf32>
    %c7_96 = arith.constant 7 : index
    %c0_97 = arith.constant 0 : index
    %194 = vector.load %arg4[%c7_96, %c0_97] : memref<25x256xbf16, #tpu.memory_space<vmem>>, vector<1x256xbf16>
    %195 = arith.truncf %193 : vector<4x256xf32> to vector<4x256xbf16>
    %196 = vector.broadcast %194 : vector<1x256xbf16> to vector<4x256xbf16>
    %197 = arith.mulf %195, %196 : vector<4x256xbf16>
    %c28_98 = arith.constant 28 : index
    %c256_99 = arith.constant 256 : index
    %198 = vector.load %arg6[%c28_98, %c256_99] : memref<100x512xbf16, #tpu.memory_space<vmem>>, vector<4x256xbf16>
    tpu.vector_store %arg6[%c28_98, %c256_99], %197 {strides = array<i32>} : memref<100x512xbf16, #tpu.memory_space<vmem>>, vector<4x256xbf16>,
    %c15_i32_100 = arith.constant 15 : i32
    %199 = tpu.dynamic_rotate %149 by %c15_i32_100 dim 1 : vector<4x256xf32>, i32 -> vector<4x256xf32>
    %c8_101 = arith.constant 8 : index
    %c0_102 = arith.constant 0 : index
    %200 = vector.load %arg4[%c8_101, %c0_102] : memref<25x256xbf16, #tpu.memory_space<vmem>>, vector<1x256xbf16>
    %201 = arith.truncf %199 : vector<4x256xf32> to vector<4x256xbf16>
    %202 = vector.broadcast %200 : vector<1x256xbf16> to vector<4x256xbf16>
    %203 = arith.mulf %201, %202 : vector<4x256xbf16>
    %c32_103 = arith.constant 32 : index
    %c256_104 = arith.constant 256 : index
    %204 = vector.load %arg6[%c32_103, %c256_104] : memref<100x512xbf16, #tpu.memory_space<vmem>>, vector<4x256xbf16>
    tpu.vector_store %arg6[%c32_103, %c256_104], %203 {strides = array<i32>} : memref<100x512xbf16, #tpu.memory_space<vmem>>, vector<4x256xbf16>,
    %c14_i32_105 = arith.constant 14 : i32
    %205 = tpu.dynamic_rotate %149 by %c14_i32_105 dim 1 : vector<4x256xf32>, i32 -> vector<4x256xf32>
    %c9_106 = arith.constant 9 : index
    %c0_107 = arith.constant 0 : index
    %206 = vector.load %arg4[%c9_106, %c0_107] : memref<25x256xbf16, #tpu.memory_space<vmem>>, vector<1x256xbf16>
    %207 = arith.truncf %205 : vector<4x256xf32> to vector<4x256xbf16>
    %208 = vector.broadcast %206 : vector<1x256xbf16> to vector<4x256xbf16>
    %209 = arith.mulf %207, %208 : vector<4x256xbf16>
    %c36_108 = arith.constant 36 : index
    %c256_109 = arith.constant 256 : index
    %210 = vector.load %arg6[%c36_108, %c256_109] : memref<100x512xbf16, #tpu.memory_space<vmem>>, vector<4x256xbf16>
    tpu.vector_store %arg6[%c36_108, %c256_109], %209 {strides = array<i32>} : memref<100x512xbf16, #tpu.memory_space<vmem>>, vector<4x256xbf16>,
    %c2_i32_110 = arith.constant 2 : i32
    %211 = tpu.dynamic_rotate %149 by %c2_i32_110 dim 1 : vector<4x256xf32>, i32 -> vector<4x256xf32>
    %c10_111 = arith.constant 10 : index
    %c0_112 = arith.constant 0 : index
    %212 = vector.load %arg4[%c10_111, %c0_112] : memref<25x256xbf16, #tpu.memory_space<vmem>>, vector<1x256xbf16>
    %213 = arith.truncf %211 : vector<4x256xf32> to vector<4x256xbf16>
    %214 = vector.broadcast %212 : vector<1x256xbf16> to vector<4x256xbf16>
    %215 = arith.mulf %213, %214 : vector<4x256xbf16>
    %c40_113 = arith.constant 40 : index
    %c256_114 = arith.constant 256 : index
    %216 = vector.load %arg6[%c40_113, %c256_114] : memref<100x512xbf16, #tpu.memory_space<vmem>>, vector<4x256xbf16>
    tpu.vector_store %arg6[%c40_113, %c256_114], %215 {strides = array<i32>} : memref<100x512xbf16, #tpu.memory_space<vmem>>, vector<4x256xbf16>,
    %c1_i32_115 = arith.constant 1 : i32
    %217 = tpu.dynamic_rotate %149 by %c1_i32_115 dim 1 : vector<4x256xf32>, i32 -> vector<4x256xf32>
    %c11_116 = arith.constant 11 : index
    %c0_117 = arith.constant 0 : index
    %218 = vector.load %arg4[%c11_116, %c0_117] : memref<25x256xbf16, #tpu.memory_space<vmem>>, vector<1x256xbf16>
    %219 = arith.truncf %217 : vector<4x256xf32> to vector<4x256xbf16>
    %220 = vector.broadcast %218 : vector<1x256xbf16> to vector<4x256xbf16>
    %221 = arith.mulf %219, %220 : vector<4x256xbf16>
    %c44_118 = arith.constant 44 : index
    %c256_119 = arith.constant 256 : index
    %222 = vector.load %arg6[%c44_118, %c256_119] : memref<100x512xbf16, #tpu.memory_space<vmem>>, vector<4x256xbf16>
    tpu.vector_store %arg6[%c44_118, %c256_119], %221 {strides = array<i32>} : memref<100x512xbf16, #tpu.memory_space<vmem>>, vector<4x256xbf16>,
    %c48_120 = arith.constant 48 : index
    %c256_121 = arith.constant 256 : index
    %223 = vector.load %arg6[%c48_120, %c256_121] : memref<100x512xbf16, #tpu.memory_space<vmem>>, vector<4x256xbf16>
    tpu.vector_store %arg6[%c48_120, %c256_121], %150 {strides = array<i32>} : memref<100x512xbf16, #tpu.memory_space<vmem>>, vector<4x256xbf16>,
    %c255_i32_122 = arith.constant 255 : i32
    %224 = tpu.dynamic_rotate %149 by %c255_i32_122 dim 1 : vector<4x256xf32>, i32 -> vector<4x256xf32>
    %c13_123 = arith.constant 13 : index
    %c0_124 = arith.constant 0 : index
    %225 = vector.load %arg4[%c13_123, %c0_124] : memref<25x256xbf16, #tpu.memory_space<vmem>>, vector<1x256xbf16>
    %226 = arith.truncf %224 : vector<4x256xf32> to vector<4x256xbf16>
    %227 = vector.broadcast %225 : vector<1x256xbf16> to vector<4x256xbf16>
    %228 = arith.mulf %226, %227 : vector<4x256xbf16>
    %c52_125 = arith.constant 52 : index
    %c256_126 = arith.constant 256 : index
    %229 = vector.load %arg6[%c52_125, %c256_126] : memref<100x512xbf16, #tpu.memory_space<vmem>>, vector<4x256xbf16>
    tpu.vector_store %arg6[%c52_125, %c256_126], %228 {strides = array<i32>} : memref<100x512xbf16, #tpu.memory_space<vmem>>, vector<4x256xbf16>,
    %c254_i32_127 = arith.constant 254 : i32
    %230 = tpu.dynamic_rotate %149 by %c254_i32_127 dim 1 : vector<4x256xf32>, i32 -> vector<4x256xf32>
    %c14_128 = arith.constant 14 : index
    %c0_129 = arith.constant 0 : index
    %231 = vector.load %arg4[%c14_128, %c0_129] : memref<25x256xbf16, #tpu.memory_space<vmem>>, vector<1x256xbf16>
    %232 = arith.truncf %230 : vector<4x256xf32> to vector<4x256xbf16>
    %233 = vector.broadcast %231 : vector<1x256xbf16> to vector<4x256xbf16>
    %234 = arith.mulf %232, %233 : vector<4x256xbf16>
    %c56_130 = arith.constant 56 : index
    %c256_131 = arith.constant 256 : index
    %235 = vector.load %arg6[%c56_130, %c256_131] : memref<100x512xbf16, #tpu.memory_space<vmem>>, vector<4x256xbf16>
    tpu.vector_store %arg6[%c56_130, %c256_131], %234 {strides = array<i32>} : memref<100x512xbf16, #tpu.memory_space<vmem>>, vector<4x256xbf16>,
    %c242_i32_132 = arith.constant 242 : i32
    %236 = tpu.dynamic_rotate %149 by %c242_i32_132 dim 1 : vector<4x256xf32>, i32 -> vector<4x256xf32>
    %c15_133 = arith.constant 15 : index
    %c0_134 = arith.constant 0 : index
    %237 = vector.load %arg4[%c15_133, %c0_134] : memref<25x256xbf16, #tpu.memory_space<vmem>>, vector<1x256xbf16>
    %238 = arith.truncf %236 : vector<4x256xf32> to vector<4x256xbf16>
    %239 = vector.broadcast %237 : vector<1x256xbf16> to vector<4x256xbf16>
    %240 = arith.mulf %238, %239 : vector<4x256xbf16>
    %c60_135 = arith.constant 60 : index
    %c256_136 = arith.constant 256 : index
    %241 = vector.load %arg6[%c60_135, %c256_136] : memref<100x512xbf16, #tpu.memory_space<vmem>>, vector<4x256xbf16>
    tpu.vector_store %arg6[%c60_135, %c256_136], %240 {strides = array<i32>} : memref<100x512xbf16, #tpu.memory_space<vmem>>, vector<4x256xbf16>,
    %c241_i32_137 = arith.constant 241 : i32
    %242 = tpu.dynamic_rotate %149 by %c241_i32_137 dim 1 : vector<4x256xf32>, i32 -> vector<4x256xf32>
    %c16_138 = arith.constant 16 : index
    %c0_139 = arith.constant 0 : index
    %243 = vector.load %arg4[%c16_138, %c0_139] : memref<25x256xbf16, #tpu.memory_space<vmem>>, vector<1x256xbf16>
    %244 = arith.truncf %242 : vector<4x256xf32> to vector<4x256xbf16>
    %245 = vector.broadcast %243 : vector<1x256xbf16> to vector<4x256xbf16>
    %246 = arith.mulf %244, %245 : vector<4x256xbf16>
    %c64_140 = arith.constant 64 : index
    %c256_141 = arith.constant 256 : index
    %247 = vector.load %arg6[%c64_140, %c256_141] : memref<100x512xbf16, #tpu.memory_space<vmem>>, vector<4x256xbf16>
    tpu.vector_store %arg6[%c64_140, %c256_141], %246 {strides = array<i32>} : memref<100x512xbf16, #tpu.memory_space<vmem>>, vector<4x256xbf16>,
    %c240_i32_142 = arith.constant 240 : i32
    %248 = tpu.dynamic_rotate %149 by %c240_i32_142 dim 1 : vector<4x256xf32>, i32 -> vector<4x256xf32>
    %c17_143 = arith.constant 17 : index
    %c0_144 = arith.constant 0 : index
    %249 = vector.load %arg4[%c17_143, %c0_144] : memref<25x256xbf16, #tpu.memory_space<vmem>>, vector<1x256xbf16>
    %250 = arith.truncf %248 : vector<4x256xf32> to vector<4x256xbf16>
    %251 = vector.broadcast %249 : vector<1x256xbf16> to vector<4x256xbf16>
    %252 = arith.mulf %250, %251 : vector<4x256xbf16>
    %c68_145 = arith.constant 68 : index
    %c256_146 = arith.constant 256 : index
    %253 = vector.load %arg6[%c68_145, %c256_146] : memref<100x512xbf16, #tpu.memory_space<vmem>>, vector<4x256xbf16>
    tpu.vector_store %arg6[%c68_145, %c256_146], %252 {strides = array<i32>} : memref<100x512xbf16, #tpu.memory_space<vmem>>, vector<4x256xbf16>,
    %c239_i32_147 = arith.constant 239 : i32
    %254 = tpu.dynamic_rotate %149 by %c239_i32_147 dim 1 : vector<4x256xf32>, i32 -> vector<4x256xf32>
    %c18_148 = arith.constant 18 : index
    %c0_149 = arith.constant 0 : index
    %255 = vector.load %arg4[%c18_148, %c0_149] : memref<25x256xbf16, #tpu.memory_space<vmem>>, vector<1x256xbf16>
    %256 = arith.truncf %254 : vector<4x256xf32> to vector<4x256xbf16>
    %257 = vector.broadcast %255 : vector<1x256xbf16> to vector<4x256xbf16>
    %258 = arith.mulf %256, %257 : vector<4x256xbf16>
    %c72_150 = arith.constant 72 : index
    %c256_151 = arith.constant 256 : index
    %259 = vector.load %arg6[%c72_150, %c256_151] : memref<100x512xbf16, #tpu.memory_space<vmem>>, vector<4x256xbf16>
    tpu.vector_store %arg6[%c72_150, %c256_151], %258 {strides = array<i32>} : memref<100x512xbf16, #tpu.memory_space<vmem>>, vector<4x256xbf16>,
    %c238_i32_152 = arith.constant 238 : i32
    %260 = tpu.dynamic_rotate %149 by %c238_i32_152 dim 1 : vector<4x256xf32>, i32 -> vector<4x256xf32>
    %c19_153 = arith.constant 19 : index
    %c0_154 = arith.constant 0 : index
    %261 = vector.load %arg4[%c19_153, %c0_154] : memref<25x256xbf16, #tpu.memory_space<vmem>>, vector<1x256xbf16>
    %262 = arith.truncf %260 : vector<4x256xf32> to vector<4x256xbf16>
    %263 = vector.broadcast %261 : vector<1x256xbf16> to vector<4x256xbf16>
    %264 = arith.mulf %262, %263 : vector<4x256xbf16>
    %c76_155 = arith.constant 76 : index
    %c256_156 = arith.constant 256 : index
    %265 = vector.load %arg6[%c76_155, %c256_156] : memref<100x512xbf16, #tpu.memory_space<vmem>>, vector<4x256xbf16>
    tpu.vector_store %arg6[%c76_155, %c256_156], %264 {strides = array<i32>} : memref<100x512xbf16, #tpu.memory_space<vmem>>, vector<4x256xbf16>,
    %c226_i32_157 = arith.constant 226 : i32
    %266 = tpu.dynamic_rotate %149 by %c226_i32_157 dim 1 : vector<4x256xf32>, i32 -> vector<4x256xf32>
    %c20_158 = arith.constant 20 : index
    %c0_159 = arith.constant 0 : index
    %267 = vector.load %arg4[%c20_158, %c0_159] : memref<25x256xbf16, #tpu.memory_space<vmem>>, vector<1x256xbf16>
    %268 = arith.truncf %266 : vector<4x256xf32> to vector<4x256xbf16>
    %269 = vector.broadcast %267 : vector<1x256xbf16> to vector<4x256xbf16>
    %270 = arith.mulf %268, %269 : vector<4x256xbf16>
    %c80_160 = arith.constant 80 : index
    %c256_161 = arith.constant 256 : index
    %271 = vector.load %arg6[%c80_160, %c256_161] : memref<100x512xbf16, #tpu.memory_space<vmem>>, vector<4x256xbf16>
    tpu.vector_store %arg6[%c80_160, %c256_161], %270 {strides = array<i32>} : memref<100x512xbf16, #tpu.memory_space<vmem>>, vector<4x256xbf16>,
    %c225_i32_162 = arith.constant 225 : i32
    %272 = tpu.dynamic_rotate %149 by %c225_i32_162 dim 1 : vector<4x256xf32>, i32 -> vector<4x256xf32>
    %c21_163 = arith.constant 21 : index
    %c0_164 = arith.constant 0 : index
    %273 = vector.load %arg4[%c21_163, %c0_164] : memref<25x256xbf16, #tpu.memory_space<vmem>>, vector<1x256xbf16>
    %274 = arith.truncf %272 : vector<4x256xf32> to vector<4x256xbf16>
    %275 = vector.broadcast %273 : vector<1x256xbf16> to vector<4x256xbf16>
    %276 = arith.mulf %274, %275 : vector<4x256xbf16>
    %c84_165 = arith.constant 84 : index
    %c256_166 = arith.constant 256 : index
    %277 = vector.load %arg6[%c84_165, %c256_166] : memref<100x512xbf16, #tpu.memory_space<vmem>>, vector<4x256xbf16>
    tpu.vector_store %arg6[%c84_165, %c256_166], %276 {strides = array<i32>} : memref<100x512xbf16, #tpu.memory_space<vmem>>, vector<4x256xbf16>,
    %c224_i32_167 = arith.constant 224 : i32
    %278 = tpu.dynamic_rotate %149 by %c224_i32_167 dim 1 : vector<4x256xf32>, i32 -> vector<4x256xf32>
    %c22_168 = arith.constant 22 : index
    %c0_169 = arith.constant 0 : index
    %279 = vector.load %arg4[%c22_168, %c0_169] : memref<25x256xbf16, #tpu.memory_space<vmem>>, vector<1x256xbf16>
    %280 = arith.truncf %278 : vector<4x256xf32> to vector<4x256xbf16>
    %281 = vector.broadcast %279 : vector<1x256xbf16> to vector<4x256xbf16>
    %282 = arith.mulf %280, %281 : vector<4x256xbf16>
    %c88_170 = arith.constant 88 : index
    %c256_171 = arith.constant 256 : index
    %283 = vector.load %arg6[%c88_170, %c256_171] : memref<100x512xbf16, #tpu.memory_space<vmem>>, vector<4x256xbf16>
    tpu.vector_store %arg6[%c88_170, %c256_171], %282 {strides = array<i32>} : memref<100x512xbf16, #tpu.memory_space<vmem>>, vector<4x256xbf16>,
    %c223_i32_172 = arith.constant 223 : i32
    %284 = tpu.dynamic_rotate %149 by %c223_i32_172 dim 1 : vector<4x256xf32>, i32 -> vector<4x256xf32>
    %c23_173 = arith.constant 23 : index
    %c0_174 = arith.constant 0 : index
    %285 = vector.load %arg4[%c23_173, %c0_174] : memref<25x256xbf16, #tpu.memory_space<vmem>>, vector<1x256xbf16>
    %286 = arith.truncf %284 : vector<4x256xf32> to vector<4x256xbf16>
    %287 = vector.broadcast %285 : vector<1x256xbf16> to vector<4x256xbf16>
    %288 = arith.mulf %286, %287 : vector<4x256xbf16>
    %c92_175 = arith.constant 92 : index
    %c256_176 = arith.constant 256 : index
    %289 = vector.load %arg6[%c92_175, %c256_176] : memref<100x512xbf16, #tpu.memory_space<vmem>>, vector<4x256xbf16>
    tpu.vector_store %arg6[%c92_175, %c256_176], %288 {strides = array<i32>} : memref<100x512xbf16, #tpu.memory_space<vmem>>, vector<4x256xbf16>,
    %c222_i32_177 = arith.constant 222 : i32
    %290 = tpu.dynamic_rotate %149 by %c222_i32_177 dim 1 : vector<4x256xf32>, i32 -> vector<4x256xf32>
    %c24_178 = arith.constant 24 : index
    %c0_179 = arith.constant 0 : index
    %291 = vector.load %arg4[%c24_178, %c0_179] : memref<25x256xbf16, #tpu.memory_space<vmem>>, vector<1x256xbf16>
    %292 = arith.truncf %290 : vector<4x256xf32> to vector<4x256xbf16>
    %293 = vector.broadcast %291 : vector<1x256xbf16> to vector<4x256xbf16>
    %294 = arith.mulf %292, %293 : vector<4x256xbf16>
    %c96_180 = arith.constant 96 : index
    %c256_181 = arith.constant 256 : index
    %295 = vector.load %arg6[%c96_180, %c256_181] : memref<100x512xbf16, #tpu.memory_space<vmem>>, vector<4x256xbf16>
    tpu.vector_store %arg6[%c96_180, %c256_181], %294 {strides = array<i32>} : memref<100x512xbf16, #tpu.memory_space<vmem>>, vector<4x256xbf16>,
    %c0_182 = arith.constant 0 : index
    %c0_183 = arith.constant 0 : index
    %296 = vector.load %arg2[%c0_182, %c0_183] : memref<4x100xbf16, #tpu.memory_space<vmem>>, vector<4x100xbf16>
    %c0_184 = arith.constant 0 : index
    %c0_185 = arith.constant 0 : index
    %297 = vector.load %arg6[%c0_184, %c0_185] : memref<100x512xbf16, #tpu.memory_space<vmem>>, vector<100x512xbf16>
    %cst = arith.constant dense<0.000000e+00> : vector<4x512xf32>
    %298 = tpu.matmul %296, %297, %cst {dimension_numbers = #tpu.dot_dimension_numbers<[1], [0], [0], [1], [0, 0, 1, 1], [], []>} : vector<4x100xbf16>, vector<100x512xbf16>, vector<4x512xf32> -> vector<4x512xf32>
    %c0_186 = arith.constant 0 : index
    %c0_187 = arith.constant 0 : index
    %299 = vector.load %arg3[%c0_186, %c0_187] : memref<4x1xf32, #tpu.memory_space<vmem>>, vector<4x1xf32>
    %300 = vector.extract_strided_slice %298 {offsets = [0, 0], sizes = [4, 256], strides = [1, 1]} : vector<4x512xf32> to vector<4x256xf32>
    %301 = vector.broadcast %299 : vector<4x1xf32> to vector<4x256xf32>
    %302 = arith.addf %300, %301 : vector<4x256xf32>
    %c0_188 = arith.constant 0 : index
    %c0_189 = arith.constant 0 : index
    %c0_190 = arith.constant 0 : index
    %303 = vector.load %arg5[%c0_188, %c0_189, %c0_190] : memref<2x4x256xf32, #tpu.memory_space<vmem>>, vector<1x4x256xf32>
    %304 = vector.shape_cast %303 : vector<1x4x256xf32> to vector<4x256xf32>
    %305 = vector.shape_cast %302 : vector<4x256xf32> to vector<1x4x256xf32>
    tpu.vector_store %arg5[%c0_188, %c0_189, %c0_190], %305 {strides = array<i32>} : memref<2x4x256xf32, #tpu.memory_space<vmem>>, vector<1x4x256xf32>,
    %306 = vector.extract_strided_slice %298 {offsets = [0, 256], sizes = [4, 256], strides = [1, 1]} : vector<4x512xf32> to vector<4x256xf32>
    %307 = vector.broadcast %299 : vector<4x1xf32> to vector<4x256xf32>
    %308 = arith.addf %306, %307 : vector<4x256xf32>
    %c1_191 = arith.constant 1 : index
    %c0_192 = arith.constant 0 : index
    %c0_193 = arith.constant 0 : index
    %309 = vector.load %arg5[%c1_191, %c0_192, %c0_193] : memref<2x4x256xf32, #tpu.memory_space<vmem>>, vector<1x4x256xf32>
    %310 = vector.shape_cast %309 : vector<1x4x256xf32> to vector<4x256xf32>
    %311 = vector.shape_cast %308 : vector<4x256xf32> to vector<1x4x256xf32>
    tpu.vector_store %arg5[%c1_191, %c0_192, %c0_193], %311 {strides = array<i32>} : memref<2x4x256xf32, #tpu.memory_space<vmem>>, vector<1x4x256xf32>,
    return
  }
  func.func @transform_0(%arg0: i32) -> (i32, i32, i32) {
    %c0_i32 = arith.constant 0 : i32
    %c0_i32_0 = arith.constant 0 : i32
    %c0_i32_1 = arith.constant 0 : i32
    return %arg0, %c0_i32, %c0_i32_0 : i32, i32, i32
  }
  func.func @transform_1(%arg0: i32) -> (i32, i32) {
    %c0_i32 = arith.constant 0 : i32
    %c0_i32_0 = arith.constant 0 : i32
    %c0_i32_1 = arith.constant 0 : i32
    return %c0_i32, %c0_i32_0 : i32, i32
  }
  func.func @transform_2(%arg0: i32) -> (i32, i32) {
    %c0_i32 = arith.constant 0 : i32
    %c0_i32_0 = arith.constant 0 : i32
    %c0_i32_1 = arith.constant 0 : i32
    return %c0_i32, %c0_i32_0 : i32, i32
  }
  func.func @transform_3(%arg0: i32) -> (i32, i32) {
    %c0_i32 = arith.constant 0 : i32
    %c0_i32_0 = arith.constant 0 : i32
    %c0_i32_1 = arith.constant 0 : i32
    return %c0_i32, %c0_i32_0 : i32, i32
  }
  func.func @transform_4(%arg0: i32) -> (i32, i32, i32) {
    %c0_i32 = arith.constant 0 : i32
    %c0_i32_0 = arith.constant 0 : i32
    %c0_i32_1 = arith.constant 0 : i32
    return %arg0, %c0_i32, %c0_i32_0 : i32, i32, i32
  }
}

</mosaic_0001>

<bundles_post_ra>
// kernel: tpu_custom_call.1
= control target key start
LH: loop header
LB: loop body
LE: loop exit
PB: predicated region body
PF: predicated region fallthrough
CT: control target
= control target key end

     0   :  { %9 = vsyncpa [#allocation4], 0  ;;  %s3772_s0 = inlined_call_operand.hbm [shape: f32[2,4,256], index: 0, kind: input, shape index: {}]   ;;  %s3773_s1 = inlined_call_operand.vmem [shape: bf16[4,100], index: 1, kind: input, shape index: {}]   ;;  %s3774_s2 = inlined_call_operand.vmem [shape: f32[4,1], index: 2, kind: input, shape index: {}]   ;;  %s3775_s3 = inlined_call_operand.hbm [shape: bf16[25,256], index: 3, kind: input, shape index: {}]   ;;  %s3776_s4 = inlined_call_operand.hbm [shape: f32[2,4,256], index: 4, kind: output, shape index: {}]  }
   0x1   :  { %10 = vsyncpa [#allocation7], 0 }
   0x2   :  { %11 = vsyncpa [#allocation5], 0  ;;  %s2904_s15 = smov [#allocation3]   ;;  %s2832_s19 = scalar_lea.hbm %s3772_s0, 256 }
   0x3   :  { %s17_s16 = sshll.u32 %s2904_s15, 4  ;;  %p2833_p0 = scmp.ne.s32.totalorder %s3772_s0, %s2832_s19  ;;  %s18_s16 = int_to_ptr.vmem [resolvable:$true] %s17_s16 }
   0x4   :  { %p2836_p1 = scmp.lt.u32.totalorder %s2832_s19, %s3772_s0 }
   0x6   :  { %p2838_p2 = pnand %p2836_p1, %p2833_p0 }
   0x8   :  { %2841 = shalt.err (!%p2838_p2)
}
   0x9   :  { %s2842_s24 = scalar_lea.vmem %s18_s16, 256  ;;  %p2847_p4 = scmp.lt.s32.totalorder %s18_s16, %s18_s16 }
   0xa   :  { %p2843_p3 = scmp.ne.s32.totalorder %s18_s16, %s2842_s24  ;;  %p2848_p5 = scmp.lt.s32.totalorder %s2842_s24, %s2842_s24 }
   0xc   :  { %p2849_p6 = por %p2848_p5, %p2847_p4 }
   0xe   :  { %p2850_p7 = pnand %p2849_p6, %p2843_p3 }
  0x10   :  { %2853 = shalt.err (!%p2850_p7)
}
  0x11   :  { %s2905_s25 = smov 128   ;;  %s2906_s26 = smov 8  }
  0x12   :  { %23 = dma.hbm_to_vmem [thread:$0]  %s3772_s0, 256, %s18_s16, [#allocation4], %s2905_s25, %s2905_s25, %s2906_s26  }
  0x13   :  { %s2907_s29 = smov [#allocation6]   ;;  %s2854_s7 = scalar_lea.hbm %s3775_s3, 512 }
  0x14   :  { %s33_s30 = sshll.u32 %s2907_s29, 4  ;;  %p2855_p8 = scmp.ne.s32.totalorder %s3775_s3, %s2854_s7  ;;  %s34_s30 = int_to_ptr.vmem [resolvable:$true] %s33_s30 }
  0x15   :  { %p2858_p9 = scmp.lt.u32.totalorder %s2854_s7, %s3775_s3 }
  0x17   :  { %p2860_p10 = pnand %p2858_p9, %p2855_p8 }
  0x19   :  { %2863 = shalt.err (!%p2860_p10)
}
  0x1a   :  { %s2864_s12 = scalar_lea.vmem %s34_s30, 512  ;;  %p2869_p12 = scmp.lt.s32.totalorder %s34_s30, %s34_s30 }
  0x1b   :  { %p2865_p11 = scmp.ne.s32.totalorder %s34_s30, %s2864_s12  ;;  %p2870_p13 = scmp.lt.s32.totalorder %s2864_s12, %s2864_s12 }
  0x1d   :  { %p2871_p0 = por %p2870_p13, %p2869_p12 }
  0x1f   :  { %p2872_p1 = pnand %p2871_p0, %p2865_p11 }
  0x21   :  { %2875 = shalt.err (!%p2872_p1)
}
  0x22   :  { %39 = dma.hbm_to_vmem [thread:$0]  %s3775_s3, 512, %s34_s30, [#allocation7], %s2905_s25, %s2905_s25, %s2906_s26  }
  0x23   :  { %2898 = dma.done.wait [#allocation4], 256  }
  0x24   :  { %2899 = vsyncadd [#allocation4], 4294967040 }
  0x25   :  { %2900 = dma.done.wait [#allocation7], 512  }
  0x26   :  { %2901 = vsyncadd [#allocation7], 4294966784  ;;  %v2989_v0 = vld [vmem:[#allocation3 + $0x8] sm:$0xff]  ;;  %v2991_v1 = vld [vmem:[#allocation3] sm:$0xff]  ;;  %s2908_s3 = smov 33   ;;  %s2909_s14 = smov 31   ;;  %v3777_v6 = vlaneseq }
  0x27   :  { %v2995_v2 = vcombine.high %v2989_v0, %v2989_v0  ;;  %v2999_v3 = vcombine.high %v2991_v1, %v2991_v1  ;;  %s2910_s15 = smov 32   ;;  %s2911_s16 = smov 34   ;;  %v1060_v7 = vld [vmem:[#allocation6] sm:$0x11]  ;;  %v1137_v11 = vld [vmem:[#allocation6] sm:$0x22] }
  0x28   :  { %s2912_s17 = smov 16   ;;  %s2913_s18 = smov 18   ;;  %v3020_v8 = vshrl.u32 %v3777_v6, 7  ;;  %v100_v9 = vld [vmem:[#allocation6] sm:$0x11]  ;;  %v2319_v10 = vcombine.low %v1060_v7, %v1060_v7  ;;  %v2320_v12 = vcombine.high %v1060_v7, %v1060_v7  ;;  %v2325_v16 = vcombine.low %v1137_v11, %v1137_v11 }
  0x29   :  { %v3003_v4 = vpack.i.bf16 %v2995_v2, %v2989_v0  ;;  %v3007_v5 = vpack.i.bf16 %v2999_v3, %v2991_v1  ;;  %v2246_v13 = vcombine.low %v100_v9, %v100_v9  ;;  %v2247_v14 = vcombine.high %v100_v9, %v100_v9  ;;  %s2914_s19 = smov 17   ;;  %s2915_s20 = smov 30   ;;  %v179_v20 = vld [vmem:[#allocation6] sm:$0x22]  ;;  %v62_v41 = vld [vmem:[#allocation6] sm:$0x11] }
  0x2a   :  { %v3025_v15 = vsub.s32 0, %v3020_v8  ;;  %v1069_v17 = vshrl.u32 %v2319_v10, 16  ;;  %v2326_v18 = vcombine.high %v1137_v11, %v1137_v11  ;;  %v1077_v19 = vshrl.u32 %v2320_v12, 16  ;;  %v141_v27 = vld [vmem:[#allocation6] sm:$0x22]  ;;  %s2916_s21 = smov 1  }
  0x2b   :  { %2464 = vrot.lane.b32.xlu1 %v3003_v4, %s2908_s3  ;;  %2454 = vrot.lane.b32.xlu0 %v3007_v5, %s2908_s3  ;;  %v109_v21 = vshrl.u32 %v2246_v13, 16  ;;  %v117_v22 = vshrl.u32 %v2247_v14, 16  ;;  %v2252_v23 = vcombine.low %v179_v20, %v179_v20  ;;  %v2253_v24 = vcombine.high %v179_v20, %v179_v20  ;;  %s2917_s22 = smov 14   ;;  %v337_v42 = vld [vmem:[#allocation6] sm:$0x88]  ;;  %s2918_s23 = smov 2  }
  0x2c   :  { %3781 = vst [vmem:[#allocation12_spill] sm:$0xff] %v3025_v15  ;;  %v1146_v25 = vshrl.u32 %v2325_v16, 16  ;;  %v1154_v26 = vshrl.u32 %v2326_v18, 16  ;;  %v1070_v28 = vpack.i.b16 %v1069_v17, %v1069_v17  ;;  %v1078_v29 = vpack.i.b16 %v1077_v19, %v1077_v19  ;;  %v258_v47 = vld [vmem:[#allocation6] sm:$0x44]  ;;  %s2919_s24 = smov 15  }
  0x2d   :  { %v110_v30 = vpack.i.b16 %v109_v21, %v109_v21  ;;  %v118_v31 = vpack.i.b16 %v117_v22, %v117_v22  ;;  %v188_v32 = vshrl.u32 %v2252_v23, 16  ;;  %v196_v33 = vshrl.u32 %v2253_v24, 16  ;;  %v1291_v48 = vld [vmem:[#allocation6] sm:$0x88]  ;;  %v1214_v52 = vld [vmem:[#allocation6] sm:$0x44] }
  0x2e   :  { %v3034_v34 = vsub.s32 1, %v3020_v8  ;;  %v1147_v35 = vpack.i.b16 %v1146_v25, %v1146_v25  ;;  %v1155_v36 = vpack.i.b16 %v1154_v26, %v1154_v26  ;;  %v2249_v37 = vcombine.low %v141_v27, %v141_v27  ;;  %v1100_v56 = vld [vmem:[#allocation6] sm:$0x22]  ;;  %v1023_v57 = vld [vmem:[#allocation6] sm:$0x11]  ;;  %s2920_s27 = smov 114  }
  0x2f   :  { %2469 = vrot.lane.b32.xlu1 %v3003_v4, %s2909_s14  ;;  %2459 = vrot.lane.b32.xlu0 %v3007_v5, %s2909_s14  ;;  %v3036_v38 = vcombine.high %v141_v27, %v141_v27  ;;  %v3039_v39 = vrot.slane %v1070_v28, %v3025_v15  ;;  %v3042_v40 = vrot.slane %v1078_v29, %v3025_v15  ;;  %s2921_s28 = smov 127   ;;  %s2922_s29 = smov 126  }
  0x30   :  { %v3045_v43 = vrot.slane %v110_v30, %v3025_v15  ;;  %v3048_v44 = vrot.slane %v118_v31, %v3025_v15  ;;  %v189_v45 = vpack.i.b16 %v188_v32, %v188_v32  ;;  %v197_v46 = vpack.i.b16 %v196_v33, %v196_v33  ;;  %s2923_s30 = smov 110   ;;  %s2924_s5 = smov 112  }
  0x31   :  { %v3053_v49 = vrot.slane %v1147_v35, %v3034_v34  ;;  %v3056_v50 = vrot.slane %v1155_v36, %v3034_v34  ;;  %v150_v51 = vpack.i.b16 %v2249_v37, %v2249_v37  ;;  %v157_v53 = vpack.i.b16 %v3036_v38, %v3036_v38  ;;  %s2925_s6 = smov 111   ;;  %s2926_s7 = smov 113  }
  0x32   :  { %v2243_v54 = vcombine.low %v62_v41, %v62_v41  ;;  %v2244_v55 = vcombine.high %v62_v41, %v62_v41  ;;  %v2264_v58 = vcombine.low %v337_v42, %v337_v42  ;;  %v2265_v59 = vcombine.high %v337_v42, %v337_v42  ;;  %s2927_s8 = smov 95   ;;  %s2928_s9 = smov 97  }
  0x33   :  { %2479 = vrot.lane.b32.xlu1 %v3007_v5, %s2910_s15  ;;  %2474 = vrot.lane.b32.xlu0 %v3007_v5, %s2911_s16  ;;  %v2258_v60 = vcombine.low %v258_v47, %v258_v47  ;;  %v2259_v61 = vcombine.high %v258_v47, %v258_v47  ;;  %v2337_v62 = vcombine.low %v1291_v48, %v1291_v48  ;;  %v3074_v30 = vsub.s32 3, %v3020_v8  ;;  %s2929_s10 = smov 96   ;;  %s2930_s11 = smov 98  }
  0x34   :  { %v3061_v63 = vrot.slane %v189_v45, %v3034_v34  ;;  %v3064_v7 = vrot.slane %v197_v46, %v3034_v34  ;;  %v2338_v9 = vcombine.high %v1291_v48, %v1291_v48  ;;  %v2331_v10 = vcombine.low %v1214_v52, %v1214_v52  ;;  %s2931_s12 = smov 94   ;;  %s2933_s14 = smov [#allocation8]  }
  0x35   :  { %v2322_v11 = vcombine.low %v1100_v56, %v1100_v56  ;;  %v2323_v12 = vcombine.high %v1100_v56, %v1100_v56  ;;  %v2316_v13 = vcombine.low %v1023_v57, %v1023_v57  ;;  %v3069_v14 = vrot.slane %v150_v51, %v3034_v34 }
  0x36   :  { %v2317_v16 = vcombine.high %v1023_v57, %v1023_v57  ;;  %v346_v17 = vshrl.u32 %v2264_v58, 16  ;;  %v2332_v18 = vcombine.high %v1214_v52, %v1214_v52  ;;  %v354_v19 = vshrl.u32 %v2265_v59, 16  ;;  %v299_v52 = vld [vmem:[#allocation6] sm:$0x88]  ;;  %v416_v58 = vld [vmem:[#allocation6 + $0x8] sm:$0x11] }
  0x37   :  { %2489 = vrot.lane.b32.xlu1 %v3003_v4, %s2910_s15  ;;  %2484 = vrot.lane.b32.xlu0 %v3003_v4, %s2911_s16  ;;  %v267_v20 = vshrl.u32 %v2258_v60, 16  ;;  %v275_v21 = vshrl.u32 %v2259_v61, 16  ;;  %v1300_v22 = vshrl.u32 %v2337_v62, 16  ;;  %v71_v23 = vpack.i.b16 %v2243_v54, %v2243_v54  ;;  %s2230_s15 = sshll.u32 %s2933_s14, 4  ;;  %s2231_s15 = int_to_ptr.vmem [resolvable:$true] %s2230_s15 }
  0x38   :  { %v78_v24 = vpack.i.b16 %v2244_v55, %v2244_v55  ;;  %v1308_v25 = vshrl.u32 %v2338_v9, 16  ;;  %v1223_v26 = vshrl.u32 %v2331_v10, 16  ;;  %v1109_v27 = vpack.i.b16 %v2322_v11, %v2322_v11  ;;  %v220_v9 = vld [vmem:[#allocation6] sm:$0x44]  ;;  %p2881_p3 = scmp.lt.s32.totalorder %s2231_s15, %s2231_s15 }
  0x39   :  { %v1116_v28 = vpack.i.b16 %v2323_v12, %v2323_v12  ;;  %v1032_v29 = vpack.i.b16 %v2316_v13, %v2316_v13  ;;  %v1039_v31 = vpack.i.b16 %v2317_v16, %v2317_v16  ;;  %v347_v32 = vpack.i.b16 %v346_v17, %v346_v17  ;;  %v1254_v13 = vld [vmem:[#allocation6] sm:$0x88]  ;;  %v1177_v16 = vld [vmem:[#allocation6] sm:$0x44] }
  0x3a   :  { %v3077_v33 = vsub.s32 2, %v3020_v8  ;;  %v1231_v35 = vshrl.u32 %v2332_v18, 16  ;;  %v355_v36 = vpack.i.b16 %v354_v19, %v354_v19  ;;  %v268_v37 = vpack.i.b16 %v267_v20, %v267_v20  ;;  %v1445_v18 = vld [vmem:[#allocation6 + $0x8] sm:$0x22] }
  0x3b   :  { %2499 = vrot.lane.b32.xlu1 %v3007_v5, %s2912_s17  ;;  %2494 = vrot.lane.b32.xlu0 %v3007_v5, %s2913_s18  ;;  %v276_v38 = vpack.i.b16 %v275_v21, %v275_v21  ;;  %v1301_v41 = vpack.i.b16 %v1300_v22, %v1300_v22  ;;  %v3080_v42 = vrot.slane %v157_v53, %v3034_v34  ;;  %v495_v53 = vld [vmem:[#allocation6 + $0x8] sm:$0x22]  ;;  %v1368_v22 = vld [vmem:[#allocation6 + $0x8] sm:$0x11] }
  0x3c   :  { %v3083_v45 = vrot.slane %v71_v23, %v3025_v15  ;;  %v1309_v46 = vpack.i.b16 %v1308_v25, %v1308_v25  ;;  %v1224_v47 = vpack.i.b16 %v1223_v26, %v1223_v26  ;;  %v3088_v8 = vrot.slane %v78_v24, %v3025_v15 }
  0x3d   :  { %v3091_v48 = vrot.slane %v1109_v27, %v3034_v34  ;;  %v3094_v51 = vrot.slane %v1116_v28, %v3034_v34  ;;  %v3097_v54 = vrot.slane %v1032_v29, %v3025_v15  ;;  %v3100_v55 = vrot.slane %v1039_v31, %v3025_v15 }
  0x3e   :  { %v3103_v56 = vrot.slane %v347_v32, %v3074_v30  ;;  %v1232_v57 = vpack.i.b16 %v1231_v35, %v1231_v35  ;;  %v3106_v59 = vrot.slane %v355_v36, %v3074_v30  ;;  %v3109_v60 = vrot.slane %v268_v37, %v3077_v33 }
  0x3f   :  { %2509 = vrot.lane.b32.xlu1 %v3003_v4, %s2912_s17  ;;  %2504 = vrot.lane.b32.xlu0 %v3003_v4, %s2913_s18  ;;  %v3112_v61 = vrot.slane %v276_v38, %v3077_v33  ;;  %v3115_v62 = vrot.slane %v1301_v41, %v3074_v30  ;;  %v3118_v10 = vrot.slane %v1309_v46, %v3074_v30 }
  0x40   :  { %v3121_v11 = vrot.slane %v1224_v47, %v3077_v33  ;;  %v2261_v12 = vcombine.low %v299_v52, %v299_v52  ;;  %v2276_v17 = vcombine.low %v495_v53, %v495_v53  ;;  %v2262_v19 = vcombine.high %v299_v52, %v299_v52 }
  0x41   :  { %v2277_v20 = vcombine.high %v495_v53, %v495_v53  ;;  %v2270_v21 = vcombine.low %v416_v58, %v416_v58  ;;  %v3126_v23 = vrot.slane %v1232_v57, %v3077_v33  ;;  %v2255_v24 = vcombine.low %v220_v9, %v220_v9 }
  0x42   :  { %3782 = vst [vmem:[#allocation13_spill] sm:$0xff] %v3121_v11  ;;  %v2256_v25 = vcombine.high %v220_v9, %v220_v9  ;;  %v2271_v26 = vcombine.high %v416_v58, %v416_v58  ;;  %v2334_v27 = vcombine.low %v1254_v13, %v1254_v13  ;;  %v2335_v28 = vcombine.high %v1254_v13, %v1254_v13 }
  0x43   :  { %2519 = vrot.lane.b32.xlu1 %v3007_v5, %s2914_s19  ;;  %2514 = vrot.lane.b32.xlu0 %v3007_v5, %s2915_s20  ;;  %3783 = vst [vmem:[#allocation14_spill] sm:$0xff] %v3126_v23  ;;  %v2328_v29 = vcombine.low %v1177_v16, %v1177_v16  ;;  %v2349_v31 = vcombine.low %v1445_v18, %v1445_v18  ;;  %v504_v35 = vshrl.u32 %v2276_v17, 16  ;;  %v512_v41 = vshrl.u32 %v2277_v20, 16 }
  0x44   :  { %v2329_v32 = vcombine.high %v1177_v16, %v1177_v16  ;;  %v2350_v36 = vcombine.high %v1445_v18, %v1445_v18  ;;  %v2343_v37 = vcombine.low %v1368_v22, %v1368_v22  ;;  %v308_v38 = vpack.i.b16 %v2261_v12, %v2261_v12 }
  0x45   :  { %v425_v46 = vshrl.u32 %v2270_v21, 16  ;;  %v2344_v47 = vcombine.high %v1368_v22, %v1368_v22  ;;  %v315_v52 = vpack.i.b16 %v2262_v19, %v2262_v19  ;;  %v229_v53 = vpack.i.b16 %v2255_v24, %v2255_v24 }
  0x46   :  { %v236_v57 = vpack.i.b16 %v2256_v25, %v2256_v25  ;;  %v433_v58 = vshrl.u32 %v2271_v26, 16  ;;  %v1263_v9 = vpack.i.b16 %v2334_v27, %v2334_v27  ;;  %v1270_v13 = vpack.i.b16 %v2335_v28, %v2335_v28 }
  0x47   :  { %2529 = vrot.lane.b32.xlu1 %v3003_v4, %s2914_s19  ;;  %2524 = vrot.lane.b32.xlu0 %v3003_v4, %s2915_s20  ;;  %v1186_v6 = vpack.i.b16 %v2328_v29, %v2328_v29  ;;  %v1454_v16 = vshrl.u32 %v2349_v31, 16  ;;  %v1193_v17 = vpack.i.b16 %v2329_v32, %v2329_v32  ;;  %v505_v18 = vpack.i.b16 %v504_v35, %v504_v35  ;;  %v457_v32 = vld [vmem:[#allocation6 + $0x8] sm:$0x22]  ;;  %v622_v35 = vld [vmem:[#allocation6 + $0x8] sm:$0x88] }
  0x48   :  { %v1462_v23 = vshrl.u32 %v2350_v36, 16  ;;  %v1377_v11 = vshrl.u32 %v2343_v37, 16  ;;  %v3133_v12 = vrot.slane %v308_v38, %v3074_v30  ;;  %v513_v19 = vpack.i.b16 %v512_v41, %v512_v41 }
  0x49   :  { %v426_v20 = vpack.i.b16 %v425_v46, %v425_v46  ;;  %v1385_v21 = vshrl.u32 %v2344_v47, 16  ;;  %v3136_v22 = vrot.slane %v315_v52, %v3074_v30  ;;  %v3139_v24 = vrot.slane %v229_v53, %v3077_v33  ;;  %v378_v46 = vld [vmem:[#allocation6 + $0x8] sm:$0x11]  ;;  %v1408_v53 = vld [vmem:[#allocation6 + $0x8] sm:$0x22] }
  0x4a   :  { %v3142_v25 = vrot.slane %v236_v57, %v3077_v33  ;;  %v434_v26 = vpack.i.b16 %v433_v58, %v433_v58  ;;  %v3145_v27 = vrot.slane %v1263_v9, %v3074_v30  ;;  %v3148_v28 = vrot.slane %v1270_v13, %v3074_v30  ;;  %v543_v57 = vld [vmem:[#allocation6 + $0x8] sm:$0x44] }
  0x4b   :  { %2539 = vrot.lane.b32.xlu1 %v3007_v5, %s2916_s21  ;;  %2534 = vrot.lane.b32.xlu0 %v3007_v5, %s2917_s22  ;;  %v3151_v29 = vrot.slane %v1186_v6, %v3077_v33  ;;  %v1455_v31 = vpack.i.b16 %v1454_v16, %v1454_v16  ;;  %v3154_v36 = vrot.slane %v1193_v17, %v3077_v33 }
  0x4c   :  { %3784 = vst [vmem:[#allocation15_spill] sm:$0xff] %v3142_v25  ;;  %3785 = vst [vmem:[#allocation16_spill] sm:$0xff] %v3145_v27  ;;  %v3157_v37 = vrot.slane %v505_v18, %v3034_v34  ;;  %v1463_v38 = vpack.i.b16 %v1462_v23, %v1462_v23  ;;  %v1378_v41 = vpack.i.b16 %v1377_v11, %v1377_v11  ;;  %v1331_v11 = vld [vmem:[#allocation6 + $0x8] sm:$0x11] }
  0x4d   :  { %3786 = vst [vmem:[#allocation17_spill] sm:$0xff] %v3148_v28  ;;  %3787 = vst [vmem:[#allocation18_spill] sm:$0xff] %v3151_v29  ;;  %v3162_v47 = vrot.slane %v513_v19, %v3034_v34  ;;  %v3165_v6 = vrot.slane %v426_v20, %v3025_v15  ;;  %v1386_v52 = vpack.i.b16 %v1385_v21, %v1385_v21 }
  0x4e   :  { %3788 = vst [vmem:[#allocation19_spill] sm:$0xff] %v3154_v36  ;;  %3789 = vst [vmem:[#allocation20_spill] sm:$0xff] %v3157_v37  ;;  %v3168_v58 = vrot.slane %v434_v26, %v3025_v15  ;;  %v2273_v9 = vcombine.low %v457_v32, %v457_v32  ;;  %v2274_v23 = vcombine.high %v457_v32, %v457_v32 }
  0x4f   :  { %2549 = vrot.lane.b32.xlu1 %v3003_v4, %s2916_s21  ;;  %2544 = vrot.lane.b32.xlu0 %v3003_v4, %s2917_s22  ;;  %3790 = vst [vmem:[#allocation21_spill] sm:$0xff] %v3162_v47  ;;  %3791 = vst [vmem:[#allocation22_spill] sm:$0xff] %v3165_v6  ;;  %v2286_v13 = vcombine.low %v622_v35, %v622_v35  ;;  %v3171_v16 = vrot.slane %v1455_v31, %v3034_v34 }
  0x50   :  { %3792 = vst [vmem:[#allocation23_spill] sm:$0xff] %v3168_v58  ;;  %v2267_v17 = vcombine.low %v378_v46, %v378_v46  ;;  %v2268_v18 = vcombine.high %v378_v46, %v378_v46  ;;  %v2287_v19 = vcombine.high %v622_v35, %v622_v35  ;;  %v3174_v47 = vrot.slane %v1463_v38, %v3034_v34  ;;  %v1569_v35 = vld [vmem:[#allocation6 + $0x8] sm:$0x88] }
  0x51   :  { %3793 = vst [vmem:[#allocation24_spill] sm:$0xff] %v3171_v16  ;;  %v3177_v20 = vrot.slane %v1378_v41, %v3025_v15  ;;  %v2346_v21 = vcombine.low %v1408_v53, %v1408_v53  ;;  %v2280_v6 = vcombine.low %v543_v57, %v543_v57  ;;  %v3182_v26 = vrot.slane %v1386_v52, %v3025_v15  ;;  %v1492_v41 = vld [vmem:[#allocation6 + $0x8] sm:$0x44] }
  0x52   :  { %3794 = vst [vmem:[#allocation25_spill] sm:$0xff] %v3174_v47  ;;  %v2347_v31 = vcombine.high %v1408_v53, %v1408_v53  ;;  %v2340_v32 = vcombine.low %v1331_v11, %v1331_v11  ;;  %v466_v46 = vpack.i.b16 %v2273_v9, %v2273_v9  ;;  %v473_v38 = vpack.i.b16 %v2274_v23, %v2274_v23 }
  0x53   :  { %2559 = vrot.lane.b32.xlu1 %v3007_v5, %s2918_s23  ;;  %2554 = vrot.lane.b32.xlu0 %v3007_v5, %s2919_s24  ;;  %3795 = vst [vmem:[#allocation26_spill] sm:$0xff] %v3177_v20  ;;  %3796 = vst [vmem:[#allocation27_spill] sm:$0xff] %v3182_v26  ;;  %v2341_v47 = vcombine.high %v1331_v11, %v1331_v11  ;;  %v631_v16 = vshrl.u32 %v2286_v13, 16  ;;  %v387_v20 = vpack.i.b16 %v2267_v17, %v2267_v17 }
  0x54   :  { %v394_v58 = vpack.i.b16 %v2268_v18, %v2268_v18  ;;  %v639_v37 = vshrl.u32 %v2287_v19, 16  ;;  %v2281_v29 = vcombine.high %v543_v57, %v543_v57  ;;  %v1417_v36 = vpack.i.b16 %v2346_v21, %v2346_v21  ;;  %v780_v19 = vld [vmem:[#allocation6 + $0x10] sm:$0x22] }
  0x55   :  { %v552_v28 = vshrl.u32 %v2280_v6, 16  ;;  %v2359_v27 = vcombine.low %v1569_v35, %v1569_v35  ;;  %v2360_v25 = vcombine.high %v1569_v35, %v1569_v35  ;;  %v1424_v52 = vpack.i.b16 %v2347_v31, %v2347_v31 }
  0x56   :  { %v1340_v53 = vpack.i.b16 %v2340_v32, %v2340_v32  ;;  %v2353_v26 = vcombine.low %v1492_v41, %v1492_v41  ;;  %v3187_v9 = vrot.slane %v466_v46, %v3034_v34  ;;  %v3190_v23 = vrot.slane %v473_v38, %v3034_v34  ;;  %v701_v46 = vld [vmem:[#allocation6 + $0x10] sm:$0x11] }
  0x57   :  { %2569 = vrot.lane.b32.xlu1 %v3003_v4, %s2918_s23  ;;  %2564 = vrot.lane.b32.xlu0 %v3003_v4, %s2919_s24  ;;  %v1347_v11 = vpack.i.b16 %v2341_v47, %v2341_v47  ;;  %v632_v13 = vpack.i.b16 %v631_v16, %v631_v16  ;;  %v3193_v57 = vrot.slane %v387_v20, %v3025_v15  ;;  %v560_v17 = vshrl.u32 %v2281_v29, 16 }
  0x58   :  { %3797 = vst [vmem:[#allocation28_spill] sm:$0xff] %v3190_v23  ;;  %v640_v6 = vpack.i.b16 %v639_v37, %v639_v37  ;;  %v2354_v18 = vcombine.high %v1492_v41, %v1492_v41  ;;  %v3196_v21 = vrot.slane %v394_v58, %v3025_v15  ;;  %v553_v31 = vpack.i.b16 %v552_v28, %v552_v28  ;;  %v1532_v28 = vld [vmem:[#allocation6 + $0x8] sm:$0x88] }
  0x59   :  { %3798 = vst [vmem:[#allocation29_spill] sm:$0xff] %v3193_v57  ;;  %v1578_v32 = vshrl.u32 %v2359_v27, 16  ;;  %v1586_v35 = vshrl.u32 %v2360_v25, 16  ;;  %v3201_v47 = vrot.slane %v1417_v36, %v3034_v34  ;;  %v3204_v29 = vrot.slane %v1424_v52, %v3034_v34  ;;  %v584_v52 = vld [vmem:[#allocation6 + $0x8] sm:$0x88] }
  0x5a   :  { %3799 = vst [vmem:[#allocation30_spill] sm:$0xff] %v3196_v21  ;;  %v3207_v37 = vrot.slane %v1340_v53, %v3025_v15  ;;  %v1501_v58 = vshrl.u32 %v2353_v26, 16  ;;  %v3210_v27 = vrot.slane %v1347_v11, %v3025_v15  ;;  %v3213_v25 = vrot.slane %v632_v13, %v3074_v30 }
  0x5b   :  { %2579 = vrot.lane.b32.xlu1 %v3007_v5, %s2920_s27  ;;  %2574 = vrot.lane.b32.xlu0 %v3007_v5, %s2921_s28  ;;  %3800 = vst [vmem:[#allocation31_spill] sm:$0xff] %v3201_v47  ;;  %3801 = vst [vmem:[#allocation32_spill] sm:$0xff] %v3204_v29  ;;  %v2298_v16 = vcombine.low %v780_v19, %v780_v19  ;;  %v2299_v20 = vcombine.high %v780_v19, %v780_v19  ;;  %v1509_v41 = vshrl.u32 %v2354_v18, 16 }
  0x5c   :  { %3802 = vst [vmem:[#allocation33_spill] sm:$0xff] %v3207_v37  ;;  %3803 = vst [vmem:[#allocation34_spill] sm:$0xff] %v3210_v27  ;;  %v3216_v38 = vrot.slane %v640_v6, %v3074_v30  ;;  %v561_v36 = vpack.i.b16 %v560_v17, %v560_v17  ;;  %v2292_v29 = vcombine.low %v701_v46, %v701_v46  ;;  %v1723_v27 = vld [vmem:[#allocation6 + $0x10] sm:$0x22]  ;;  %v1646_v6 = vld [vmem:[#allocation6 + $0x10] sm:$0x11] }
  0x5d   :  { %3804 = vst [vmem:[#allocation35_spill] sm:$0xff] %v3213_v25  ;;  %v3219_v53 = vrot.slane %v553_v31, %v3077_v33  ;;  %v1579_v26 = vpack.i.b16 %v1578_v32, %v1578_v32  ;;  %v1587_v37 = vpack.i.b16 %v1586_v35, %v1586_v35  ;;  %v2293_v11 = vcombine.high %v701_v46, %v701_v46 }
  0x5e   :  { %3805 = vst [vmem:[#allocation36_spill] sm:$0xff] %v3216_v38  ;;  %v1502_v13 = vpack.i.b16 %v1501_v58, %v1501_v58  ;;  %v2356_v19 = vcombine.low %v1532_v28, %v1532_v28  ;;  %v2357_v25 = vcombine.high %v1532_v28, %v1532_v28  ;;  %v2283_v38 = vcombine.low %v584_v52, %v584_v52 }
  0x5f   :  { %2589 = vrot.lane.b32.xlu1 %v3003_v4, %s2920_s27  ;;  %2584 = vrot.lane.b32.xlu0 %v3003_v4, %s2921_s28  ;;  %3806 = vst [vmem:[#allocation37_spill] sm:$0xff] %v3219_v53  ;;  %v2284_v17 = vcombine.high %v584_v52, %v584_v52  ;;  %v789_v18 = vshrl.u32 %v2298_v16, 16  ;;  %v797_v47 = vshrl.u32 %v2299_v20, 16  ;;  %v710_v57 = vshrl.u32 %v2292_v29, 16 }
  0x60   :  { %v2371_v21 = vcombine.low %v1723_v27, %v1723_v27  ;;  %v2421_v31 = vpack.c.bf16 %v2999_v3, %v2991_v1  ;;  %v2422_v32 = vpack.c.bf16 %v2995_v2, %v2989_v0  ;;  %v1510_v35 = vpack.i.b16 %v1509_v41, %v1509_v41 }
  0x61   :  { %v718_v46 = vshrl.u32 %v2293_v11, 16  ;;  %v2372_v53 = vcombine.high %v1723_v27, %v1723_v27  ;;  %v2365_v23 = vcombine.low %v1646_v6, %v1646_v6  ;;  %v3230_v58 = vrot.slane %v561_v36, %v3077_v33 }
  0x62   :  { %v3233_v29 = vrot.slane %v1579_v26, %v3074_v30  ;;  %v1541_v1 = vpack.i.b16 %v2356_v19, %v2356_v19  ;;  %535 = vst [vmem:[#allocation2 + $0x60] sm:$0x33] %v2421_v31  ;;  %1485 = vst [vmem:[#allocation2 + $0x68] sm:$0x33] %v2422_v32  ;;  %v1548_v0 = vpack.i.b16 %v2357_v25, %v2357_v25  ;;  %v1732_v41 = vshrl.u32 %v2371_v21, 16 }
  0x63   :  { %2599 = vrot.lane.b32.xlu1 %v3003_v4, %s2922_s29  ;;  %2594 = vrot.lane.b32.xlu0 %v3007_v5, %s2922_s29  ;;  %3807 = vst [vmem:[#allocation38_spill] sm:$0xff] %v3230_v58  ;;  %v593_v2 = vpack.i.b16 %v2283_v38, %v2283_v38  ;;  %v600_v3 = vpack.i.b16 %v2284_v17, %v2284_v17  ;;  %v1740_v36 = vshrl.u32 %v2372_v53, 16  ;;  %v1655_v58 = vshrl.u32 %v2365_v23, 16  ;;  %v938_v53 = vld [vmem:[#allocation6 + $0x10] sm:$0x88] }
  0x64   :  { %v2366_v27 = vcombine.high %v1646_v6, %v1646_v6  ;;  %v790_v28 = vpack.i.b16 %v789_v18, %v789_v18  ;;  %v798_v16 = vpack.i.b16 %v797_v47, %v797_v47  ;;  %v711_v20 = vpack.i.b16 %v710_v57, %v710_v57  ;;  %v742_v57 = vld [vmem:[#allocation6 + $0x10] sm:$0x22]  ;;  %v663_v31 = vld [vmem:[#allocation6 + $0x10] sm:$0x11] }
  0x65   :  { %v3236_v52 = vrot.slane %v1587_v37, %v3074_v30  ;;  %v719_v11 = vpack.i.b16 %v718_v46, %v718_v46  ;;  %v3241_v26 = vrot.slane %v1502_v13, %v3077_v33  ;;  %v3244_v25 = vrot.slane %v1510_v35, %v3077_v33  ;;  %v859_v13 = vld [vmem:[#allocation6 + $0x10] sm:$0x44] }
  0x66   :  { %v3247_v47 = vrot.slane %v1541_v1, %v3074_v30  ;;  %v3250_v21 = vrot.slane %v1548_v0, %v3074_v30  ;;  %v3253_v37 = vrot.slane %v593_v2, %v3074_v30  ;;  %v3256_v23 = vrot.slane %v600_v3, %v3074_v30  ;;  %v1686_v0 = vld [vmem:[#allocation6 + $0x10] sm:$0x22]  ;;  %v1609_v2 = vld [vmem:[#allocation6 + $0x10] sm:$0x11] }
  0x67   :  { %2609 = vrot.lane.b32.xlu1 %v3007_v5, %s2923_s30  ;;  %2604 = vrot.lane.b32.xlu0 %v3007_v5, %s2924_s5  ;;  %3808 = vst [vmem:[#allocation39_spill] sm:$0xff] %v3236_v52  ;;  %3809 = vst [vmem:[#allocation40_spill] sm:$0xff] %v3241_v26  ;;  %v1663_v38 = vshrl.u32 %v2366_v27, 16  ;;  %v3259_v19 = vrot.slane %v790_v28, %v3034_v34  ;;  %v3262_v6 = vrot.slane %v798_v16, %v3034_v34  ;;  %v3819_v3 = vlaneseq  ;;  %v900_v52 = vld [vmem:[#allocation6 + $0x10] sm:$0x88] }
  0x68   :  { %3810 = vst [vmem:[#allocation41_spill] sm:$0xff] %v3244_v25  ;;  %3811 = vst [vmem:[#allocation42_spill] sm:$0xff] %v3247_v47  ;;  %v3265_v17 = vrot.slane %v711_v20, %v3025_v15  ;;  %v1733_v18 = vpack.i.b16 %v1732_v41, %v1732_v41  ;;  %v3268_v32 = vrot.slane %v719_v11, %v3025_v15 }
  0x69   :  { %3812 = vst [vmem:[#allocation43_spill] sm:$0xff] %v3250_v21  ;;  %3813 = vst [vmem:[#allocation44_spill] sm:$0xff] %v3253_v37  ;;  %v1741_v35 = vpack.i.b16 %v1740_v36, %v1740_v36  ;;  %v1656_v46 = vpack.i.b16 %v1655_v58, %v1655_v58  ;;  %v2295_v1 = vcombine.low %v742_v57, %v742_v57  ;;  %v3273_v27 = vand.u32 127, %v3819_v3 }
  0x6a   :  { %3814 = vst [vmem:[#allocation45_spill] sm:$0xff] %v3256_v23  ;;  %3815 = vst [vmem:[#allocation46_spill] sm:$0xff] %v3259_v19  ;;  %v2310_v28 = vcombine.low %v938_v53, %v938_v53  ;;  %v2311_v16 = vcombine.high %v938_v53, %v938_v53  ;;  %v2304_v20 = vcombine.low %v859_v13, %v859_v13  ;;  %v1877_v53 = vld [vmem:[#allocation6 + $0x10] sm:$0x88] }
  0x6b   :  { %2619 = vrot.lane.b32.xlu1 %v3003_v4, %s2923_s30  ;;  %2614 = vrot.lane.b32.xlu0 %v3003_v4, %s2924_s5  ;;  %3816 = vst [vmem:[#allocation47_spill] sm:$0xff] %v3262_v6  ;;  %3817 = vst [vmem:[#allocation48_spill] sm:$0xff] %v3265_v17  ;;  %v1664_v41 = vpack.i.b16 %v1663_v38, %v1663_v38  ;;  %v2296_v17 = vcombine.high %v742_v57, %v742_v57  ;;  %vm97_vm0 = vcmp.lt.s32.totalorder %v3273_v27, 33 }
  0x6c   :  { %3818 = vst [vmem:[#allocation49_spill] sm:$0xff] %v3268_v32  ;;  %v2289_v11 = vcombine.low %v663_v31, %v663_v31  ;;  %v2290_v32 = vcombine.high %v663_v31, %v663_v31  ;;  %v3276_v58 = vrot.slane %v1733_v18, %v3034_v34  ;;  %v2368_v36 = vcombine.low %v1686_v0, %v1686_v0  ;;  %v1800_v31 = vld [vmem:[#allocation6 + $0x10] sm:$0x44] }
  0x6d   :  { %v2369_v6 = vcombine.high %v1686_v0, %v1686_v0  ;;  %v2362_v19 = vcombine.low %v1609_v2, %v1609_v2  ;;  %v751_v3 = vpack.i.b16 %v2295_v1, %v2295_v1  ;;  %v2363_v23 = vcombine.high %v1609_v2, %v1609_v2 }
  0x6e   :  { %3820 = vst [vmem:[#allocation50_spill] sm:$0xff] %v3276_v58  ;;  %v947_v37 = vshrl.u32 %v2310_v28, 16  ;;  %v955_v38 = vshrl.u32 %v2311_v16, 16  ;;  %v2305_v57 = vcombine.high %v859_v13, %v859_v13  ;;  %v868_v21 = vshrl.u32 %v2304_v20, 16 }
  0x6f   :  { %2629 = vrot.lane.b32.xlu1 %v3007_v5, %s2925_s6  ;;  %2624 = vrot.lane.b32.xlu0 %v3007_v5, %s2926_s7  ;;  %v3285_v18 = vrot.slane %v1664_v41, %v3025_v15  ;;  %v758_v58 = vpack.i.b16 %v2296_v17, %v2296_v17  ;;  %v672_v0 = vpack.i.b16 %v2289_v11, %v2289_v11  ;;  %v821_v11 = vld [vmem:[#allocation6 + $0x10] sm:$0x44]  ;;  %vm176_vm1 = vcmp.lt.s32.totalorder %v3273_v27, 31 }
  0x70   :  { %v679_v47 = vpack.i.b16 %v2290_v32, %v2290_v32  ;;  %v1695_v25 = vpack.i.b16 %v2368_v36, %v2368_v36  ;;  %v2383_v26 = vcombine.low %v1877_v53, %v1877_v53  ;;  %v1625_v1 = vpack.i.b16 %v2363_v23, %v2363_v23 }
  0x71   :  { %v2384_v2 = vcombine.high %v1877_v53, %v1877_v53  ;;  %v2377_v28 = vcombine.low %v1800_v31, %v1800_v31  ;;  %v948_v16 = vpack.i.b16 %v947_v37, %v947_v37  ;;  %v956_v13 = vpack.i.b16 %v955_v38, %v955_v38  ;;  %v1763_v38 = vld [vmem:[#allocation6 + $0x10] sm:$0x44] }
  0x72   :  { %v869_v20 = vpack.i.b16 %v868_v21, %v868_v21  ;;  %v3291_v41 = vrot.slane %v758_v58, %v3034_v34  ;;  %v3294_v17 = vrot.slane %v672_v0, %v3025_v15  ;;  %v3300_v32 = vrot.slane %v1695_v25, %v3034_v34 }
  0x73   :  { %2639 = vrot.lane.b32.xlu1 %v3003_v4, %s2925_s6  ;;  %2634 = vrot.lane.b32.xlu0 %v3003_v4, %s2926_s7  ;;  %v1886_v37 = vshrl.u32 %v2383_v26, 16  ;;  %v3309_v58 = vrot.slane %v1625_v1, %v3025_v15  ;;  %v1894_v36 = vshrl.u32 %v2384_v2, 16  ;;  %v2307_v53 = vcombine.low %v900_v52, %v900_v52  ;;  %v1917_v1 = vld [vmem:[#allocation6 + $0x18] sm:$0x11] }
  0x74   :  { %3823 = vst [vmem:[#allocation53_spill] sm:$0xff] %v3291_v41  ;;  %3824 = vst [vmem:[#allocation54_spill] sm:$0xff] %v3294_v17  ;;  %v3315_v25 = vrot.slane %v956_v13, %v3074_v30  ;;  %v2301_v0 = vcombine.low %v821_v11, %v821_v11  ;;  %v979_v2 = vld [vmem:[#allocation6 + $0x18] sm:$0x11]  ;;  %vm138_vm2 = vcmp.lt.s32.totalorder %v3273_v27, 32  ;;  %vm59_vm3 = vcmp.lt.s32.totalorder %v3273_v27, 34 }
  0x75   :  { %3826 = vst [vmem:[#allocation56_spill] sm:$0xff] %v3300_v32  ;;  %3829 = vst [vmem:[#allocation59_spill] sm:$0xff] %v3309_v58  ;;  %vm334_vm4 = vcmp.lt.s32.totalorder %v3273_v27, 16  ;;  %vm255_vm5 = vcmp.lt.s32.totalorder %v3273_v27, 18  ;;  %vm296_vm6 = vcmp.lt.s32.totalorder %v3273_v27, 17  ;;  %vm217_vm7 = vcmp.lt.s32.totalorder %v3273_v27, 30 }
  0x76   :  { %3831 = vst [vmem:[#allocation61_spill] sm:$0xff] %v3315_v25  ;;  %v909_v25 = vpack.i.b16 %v2307_v53, %v2307_v53  ;;  %v830_v32 = vpack.i.b16 %v2301_v0, %v2301_v0  ;;  %vm492_vm8 = vcmp.lt.s32.totalorder %v3273_v27, 1  ;;  %vm413_vm9 = vcmp.lt.s32.totalorder %v3273_v27, 14 }
  0x77   :  { %2649 = vrot.lane.b32.xlu1 %v3007_v5, %s2927_s8  ;;  %2644 = vrot.lane.b32.xlu0 %v3007_v5, %s2928_s9  ;;  %vm454_vm10 = vcmp.lt.s32.totalorder %v3273_v27, 2  ;;  %vm375_vm11 = vcmp.lt.s32.totalorder %v3273_v27, 15  ;;  %vm619_vm12 = vcmp.lt.s32.totalorder %v3273_v27, 114  ;;  %vm540_vm13 = vcmp.lt.s32.totalorder %v3273_v27, 127 }
  0x78   :  { %v3335_v53 = vrot.slane %v909_v25, %v3074_v30  ;;  %vm581_vm14 = vcmp.lt.s32.totalorder %v3273_v27, 126  ;;  %vm777_vm15 = vcmp.lt.s32.totalorder %v3273_v27, 110 }
  0x7b   :  { %2659 = vrot.lane.b32.xlu1 %v3003_v4, %s2927_s8  ;;  %2654 = vrot.lane.b32.xlu0 %v3003_v4, %s2928_s9 }
  0x7f   :  { %2669 = vrot.lane.b32.xlu1 %v3007_v5, %s2929_s10  ;;  %2664 = vrot.lane.b32.xlu0 %v3007_v5, %s2930_s11 }
  0x83   :  { %2679 = vrot.lane.b32.xlu1 %v3003_v4, %s2929_s10  ;;  %2674 = vrot.lane.b32.xlu0 %v3003_v4, %s2930_s11 }
  0x87   :  { %2689 = vrot.lane.b32.xlu1 %v3003_v4, %s2931_s12  ;;  %2684 = vrot.lane.b32.xlu0 %v3007_v5, %s2931_s12  ;;  %v3279_v4 = vrot.slane %v1741_v35, %v3034_v34  ;;  %v3282_v5 = vrot.slane %v1656_v46, %v3025_v15  ;;  %v1702_v35 = vpack.i.b16 %v2369_v6, %v2369_v6 }
  0x88   :  { %v3288_v46 = vrot.slane %v751_v3, %v3034_v34  ;;  %v2378_v6 = vcombine.high %v1800_v31, %v1800_v31  ;;  %v1809_v3 = vshrl.u32 %v2377_v28, 16  ;;  %v2308_v31 = vcombine.high %v900_v52, %v900_v52 }
  0x89   :  { %3821 = vst [vmem:[#allocation51_spill] sm:$0xff] %v3279_v4  ;;  %3822 = vst [vmem:[#allocation52_spill] sm:$0xff] %v3282_v5  ;;  %v1618_v4 = vpack.i.b16 %v2362_v19, %v2362_v19  ;;  %v876_v5 = vshrl.u32 %v2305_v57, 16  ;;  %v3297_v19 = vrot.slane %v679_v47, %v3025_v15  ;;  %v3303_v23 = vrot.slane %v1702_v35, %v3034_v34  ;;  %v1840_v47 = vld [vmem:[#allocation6 + $0x10] sm:$0x88] }
  0x8a   :  { %v3312_v57 = vrot.slane %v948_v16, %v3074_v30  ;;  %v3318_v34 = vrot.slane %v869_v20, %v3077_v33  ;;  %v1817_v26 = vshrl.u32 %v2378_v6, 16  ;;  %v2302_v35 = vcombine.high %v821_v11, %v821_v11 }
  0x8b   :  { %3825 = vst [vmem:[#allocation55_spill] sm:$0xff] %v3297_v19  ;;  %3827 = vst [vmem:[#allocation57_spill] sm:$0xff] %v3303_v23  ;;  %v3306_v21 = vrot.slane %v1618_v4, %v3025_v15  ;;  %v877_v4 = vpack.i.b16 %v876_v5, %v876_v5  ;;  %v2380_v28 = vcombine.low %v1840_v47, %v1840_v47 }
  0x8c   :  { %3830 = vst [vmem:[#allocation60_spill] sm:$0xff] %v3312_v57  ;;  %3832 = vst [vmem:[#allocation62_spill] sm:$0xff] %v3318_v34  ;;  %v2381_v58 = vcombine.high %v1840_v47, %v1840_v47  ;;  %v2375_v16 = vcombine.high %v1763_v38, %v1763_v38  ;;  %v1887_v57 = vpack.i.b16 %v1886_v37, %v1886_v37 }
  0x8d   :  { %3828 = vst [vmem:[#allocation58_spill] sm:$0xff] %v3306_v21  ;;  %v2374_v21 = vcombine.low %v1763_v38, %v1763_v38  ;;  %v1895_v23 = vpack.i.b16 %v1894_v36, %v1894_v36  ;;  %v1810_v13 = vpack.i.b16 %v1809_v3, %v1809_v3  ;;  %v3322_v20 = vrot.slane %v877_v4, %v3077_v33 }
  0x8e   :  { %v2386_v5 = vcombine.low %v1917_v1, %v1917_v1  ;;  %v2387_v6 = vcombine.high %v1917_v1, %v1917_v1  ;;  %v2313_v52 = vcombine.low %v979_v2, %v979_v2  ;;  %v1818_v34 = vpack.i.b16 %v1817_v26, %v1817_v26 }
  0x8f   :  { %v916_v11 = vpack.i.b16 %v2308_v31, %v2308_v31  ;;  %v837_v19 = vpack.i.b16 %v2302_v35, %v2302_v35  ;;  %v1849_v17 = vpack.i.b16 %v2380_v28, %v2380_v28  ;;  %v1856_v47 = vpack.i.b16 %v2381_v58, %v2381_v58 }
  0x90   :  { %v1772_v41 = vpack.i.b16 %v2374_v21, %v2374_v21  ;;  %v1779_v38 = vpack.i.b16 %v2375_v16, %v2375_v16  ;;  %v3326_v37 = vrot.slane %v1887_v57, %v3074_v30  ;;  %v3329_v36 = vrot.slane %v1895_v23, %v3074_v30 }
  0x91   :  { %v3332_v3 = vrot.slane %v1810_v13, %v3077_v33  ;;  %v1926_v4 = vpack.i.b16 %v2386_v5, %v2386_v5  ;;  %v1933_v26 = vpack.i.b16 %v2387_v6, %v2387_v6  ;;  %v3337_v31 = vcombine.high %v979_v2, %v979_v2 }
  0x92   :  { %v988_v0 = vpack.i.b16 %v2313_v52, %v2313_v52  ;;  %v3340_v21 = vrot.slane %v1818_v34, %v3077_v33  ;;  %v3343_v58 = vrot.slane %v916_v11, %v3074_v30  ;;  %v3346_v23 = vrot.slane %v830_v32, %v3077_v33 }
  0x93   :  { %3833 = vst [vmem:[#allocation63_spill] sm:$0xff] %v3337_v31  ;;  %v3349_v57 = vrot.slane %v837_v19, %v3077_v33  ;;  %v3353_v1 = vrot.slane %v1849_v17, %v3074_v30  ;;  %v3356_v2 = vrot.slane %v1856_v47, %v3074_v30  ;;  %v3359_v34 = vrot.slane %v1772_v41, %v3077_v33 }
  0x94   :  { %v3362_v28 = vrot.slane %v1779_v38, %v3077_v33  ;;  %v3365_v5 = vrot.slane %v1926_v4, %v3025_v15  ;;  %v3368_v6 = vrot.slane %v1933_v26, %v3025_v15  ;;  %v3371_v17 = vrot.slane %v988_v0, %v3025_v15 }
  0x96   :  { %3834 = vst [vmem:[#allocation64_spill] sm:$0xff] %v3368_v6  ;;  %3835 = vst [vmem:[#allocation65_spill] sm:$0xff] %v3371_v17 }
  0x9d   :  { %v2465_v35 = vpop.permute.xlu1 %2464  ;;  %v2455_v25 = vpop.permute.xlu0 %2454 }
  0x9e   :  { %v2467_v32 = vunpack.i.h.bf16 %v2465_v35  ;;  %v2466_v16 = vunpack.i.l.bf16 %v2465_v35  ;;  %v2457_v19 = vunpack.i.h.bf16 %v2455_v25  ;;  %v2456_v13 = vunpack.i.l.bf16 %v2455_v25 }
  0xa0   :  { %v1058_v33 = vsel %vm97_vm0, %v2466_v16, %v2467_v32  ;;  %v1059_v41 = vsel %vm97_vm0, %v2467_v32, %v2466_v16  ;;  %v98_v52 = vsel %vm97_vm0, %v2456_v13, %v2457_v19  ;;  %v99_v11 = vsel %vm97_vm0, %v2457_v19, %v2456_v13 }
  0xa1   :  { %v1061_v47 = vpack.c.bf16 %v1059_v41, %v1059_v41  ;;  %v1062_v38 = vpack.c.bf16 %v1058_v33, %v1058_v33  ;;  %v101_v4 = vpack.c.bf16 %v99_v11, %v99_v11  ;;  %v102_v26 = vpack.c.bf16 %v98_v52, %v98_v52  ;;  %v2470_v0 = vpop.permute.xlu1 %2469  ;;  %v2460_v35 = vpop.permute.xlu0 %2459 }
  0xa2   :  { %v2472_v25 = vunpack.i.h.bf16 %v2470_v0  ;;  %v2471_v30 = vunpack.i.l.bf16 %v2470_v0  ;;  %v2462_v17 = vunpack.i.h.bf16 %v2460_v35  ;;  %v2461_v6 = vunpack.i.l.bf16 %v2460_v35 }
  0xa3   :  { %v1084_v32 = vmul.bf16 %v3039_v39, %v1061_v47  ;;  %v1085_v16 = vmul.bf16 %v3042_v40, %v1062_v38  ;;  %v124_v31 = vmul.bf16 %v3045_v43, %v101_v4  ;;  %v125_v19 = vmul.bf16 %v3048_v44, %v102_v26 }
  0xa4   :  { %v1135_v13 = vsel %vm176_vm1, %v2471_v30, %v2472_v25  ;;  %v1136_v33 = vsel %vm176_vm1, %v2472_v25, %v2471_v30  ;;  %v177_v41 = vsel %vm176_vm1, %v2461_v6, %v2462_v17  ;;  %v178_v52 = vsel %vm176_vm1, %v2462_v17, %v2461_v6 }
  0xa5   :  { %v2321_v11 = vcombine.low %v1084_v32, %v1085_v16  ;;  %v2248_v39 = vcombine.low %v124_v31, %v125_v19  ;;  %v1138_v47 = vpack.c.bf16 %v1136_v33, %v1136_v33  ;;  %v1139_v40 = vpack.c.bf16 %v1135_v13, %v1135_v13  ;;  %v2480_v38 = vpop.permute.xlu1 %2479  ;;  %v2475_v43 = vpop.permute.xlu0 %2474 }
  0xa6   :  { %v180_v4 = vpack.c.bf16 %v178_v52, %v178_v52  ;;  %v181_v44 = vpack.c.bf16 %v177_v41, %v177_v41  ;;  %v2482_v26 = vunpack.i.h.bf16 %v2480_v38  ;;  %v2481_v0 = vunpack.i.l.bf16 %v2480_v38 }
  0xa7   :  { %v1091_v35 = vrot.slane %v2321_v11, 6  ;;  %v131_v30 = vrot.slane %v2248_v39, 6  ;;  %v1161_v25 = vmul.bf16 %v3053_v49, %v1138_v47  ;;  %v1162_v15 = vmul.bf16 %v3056_v50, %v1139_v40 }
  0xa8   :  { %v203_v6 = vmul.bf16 %v3061_v63, %v180_v4  ;;  %v204_v31 = vmul.bf16 %v3064_v7, %v181_v44  ;;  %v139_v17 = vsel %vm138_vm2, %v2481_v0, %v2482_v26  ;;  %v140_v32 = vsel %vm138_vm2, %v2482_v26, %v2481_v0 }
  0xa9   :  { %1093 = vst [vmem:[#allocation2 + $0x8] sm:$0xcc] %v1091_v35  ;;  %133 = vst [vmem:[#allocation2] sm:$0xcc] %v131_v30  ;;  %v2327_v16 = vcombine.low %v1161_v25, %v1162_v15  ;;  %v142_v19 = vpack.c.bf16 %v140_v32, %v140_v32  ;;  %v143_v13 = vpack.c.bf16 %v139_v17, %v139_v17  ;;  %v2477_v33 = vunpack.i.h.bf16 %v2475_v43  ;;  %v2490_v41 = vpop.permute.xlu1 %2489  ;;  %v2485_v49 = vpop.permute.xlu0 %2484 }
  0xaa   :  { %v2254_v50 = vcombine.low %v203_v6, %v204_v31  ;;  %v2476_v63 = vunpack.i.l.bf16 %v2475_v43  ;;  %v2492_v52 = vunpack.i.h.bf16 %v2490_v41  ;;  %v2491_v7 = vunpack.i.l.bf16 %v2490_v41 }
  0xab   :  { %v1168_v11 = vrot.slane %v2327_v16, 6  ;;  %v163_v39 = vmul.bf16 %v3069_v14, %v142_v19  ;;  %v164_v47 = vmul.bf16 %v3080_v42, %v143_v13  ;;  %v2487_v40 = vunpack.i.h.bf16 %v2485_v49 }
  0xac   :  { %v210_v38 = vrot.slane %v2254_v50, 6  ;;  %v60_v15 = vsel %vm59_vm3, %v2476_v63, %v2477_v33  ;;  %v61_v4 = vsel %vm59_vm3, %v2477_v33, %v2476_v63  ;;  %v1098_v44 = vsel %vm138_vm2, %v2491_v7, %v2492_v52 }
  0xad   :  { %1170 = vst [vmem:[#allocation2 + $0x18] sm:$0xcc] %v1168_v11  ;;  %v2251_v43 = vcombine.low %v163_v39, %v164_v47  ;;  %v63_v26 = vpack.c.bf16 %v61_v4, %v61_v4  ;;  %v64_v0 = vpack.c.bf16 %v60_v15, %v60_v15  ;;  %v1099_v14 = vsel %vm138_vm2, %v2492_v52, %v2491_v7  ;;  %v2500_v35 = vpop.permute.xlu1 %2499  ;;  %v2495_v42 = vpop.permute.xlu0 %2494 }
  0xae   :  { %212 = vst [vmem:[#allocation2 + $0x10] sm:$0xcc] %v210_v38  ;;  %v1101_v30 = vpack.c.bf16 %v1099_v14, %v1099_v14  ;;  %v1102_v25 = vpack.c.bf16 %v1098_v44, %v1098_v44  ;;  %v2486_v6 = vunpack.i.l.bf16 %v2485_v49  ;;  %v2502_v31 = vunpack.i.h.bf16 %v2500_v35 }
  0xaf   :  { %171 = vst [vmem:[#allocation2 + $0x10] sm:$0x33] %v2251_v43  ;;  %v84_v17 = vmul.bf16 %v3083_v45, %v63_v26  ;;  %v85_v32 = vmul.bf16 %v3088_v8, %v64_v0  ;;  %v2501_v16 = vunpack.i.l.bf16 %v2500_v35  ;;  %v2497_v19 = vunpack.i.h.bf16 %v2495_v42 }
  0xb0   :  { %v1122_v13 = vmul.bf16 %v3091_v48, %v1101_v30  ;;  %v1123_v33 = vmul.bf16 %v3094_v51, %v1102_v25  ;;  %v1021_v41 = vsel %vm59_vm3, %v2486_v6, %v2487_v40  ;;  %v1022_v50 = vsel %vm59_vm3, %v2487_v40, %v2486_v6 }
  0xb1   :  { %v2245_v63 = vcombine.low %v84_v17, %v85_v32  ;;  %v1024_v49 = vpack.c.bf16 %v1022_v50, %v1022_v50  ;;  %v1025_v52 = vpack.c.bf16 %v1021_v41, %v1021_v41  ;;  %v335_v45 = vsel %vm334_vm4, %v2501_v16, %v2502_v31  ;;  %v2510_v7 = vpop.permute.xlu1 %2509  ;;  %v2505_v8 = vpop.permute.xlu0 %2504 }
  0xb2   :  { %v2324_v11 = vcombine.low %v1122_v13, %v1123_v33  ;;  %v336_v48 = vsel %vm334_vm4, %v2502_v31, %v2501_v16  ;;  %v339_v51 = vpack.c.bf16 %v335_v45, %v335_v45  ;;  %v2496_v39 = vunpack.i.l.bf16 %v2495_v42 }
  0xb3   :  { %92 = vst [vmem:[#allocation2] sm:$0x33] %v2245_v63  ;;  %v1045_v47 = vmul.bf16 %v3097_v54, %v1024_v49  ;;  %v1046_v40 = vmul.bf16 %v3100_v55, %v1025_v52  ;;  %v338_v38 = vpack.c.bf16 %v336_v48, %v336_v48  ;;  %v2512_v15 = vunpack.i.h.bf16 %v2510_v7 }
  0xb4   :  { %1130 = vst [vmem:[#allocation2 + $0x18] sm:$0x33] %v2324_v11  ;;  %v362_v4 = vmul.bf16 %v3106_v59, %v339_v51  ;;  %v256_v44 = vsel %vm255_vm5, %v2496_v39, %v2497_v19  ;;  %v257_v43 = vsel %vm255_vm5, %v2497_v19, %v2496_v39  ;;  %v2511_v26 = vunpack.i.l.bf16 %v2510_v7  ;;  %v3836_v39 = vld [vmem:[#allocation13_spill] sm:$0xff] }
  0xb5   :  { %v2318_v0 = vcombine.low %v1045_v47, %v1046_v40  ;;  %v361_v14 = vmul.bf16 %v3103_v56, %v338_v38  ;;  %v259_v35 = vpack.c.bf16 %v257_v43, %v257_v43  ;;  %v260_v42 = vpack.c.bf16 %v256_v44, %v256_v44  ;;  %v2520_v54 = vpop.permute.xlu1 %2519  ;;  %v2515_v30 = vpop.permute.xlu0 %2514 }
  0xb6   :  { %v1289_v55 = vsel %vm334_vm4, %v2511_v26, %v2512_v15  ;;  %v1290_v59 = vsel %vm334_vm4, %v2512_v15, %v2511_v26  ;;  %v2507_v25 = vunpack.i.h.bf16 %v2505_v8  ;;  %v2506_v6 = vunpack.i.l.bf16 %v2505_v8 }
  0xb7   :  { %1053 = vst [vmem:[#allocation2 + $0x8] sm:$0x33] %v2318_v0  ;;  %v2266_v31 = vcombine.low %v361_v14, %v362_v4  ;;  %v282_v17 = vmul.bf16 %v3109_v60, %v259_v35  ;;  %v283_v32 = vmul.bf16 %v3112_v61, %v260_v42  ;;  %v1292_v16 = vpack.c.bf16 %v1290_v59, %v1290_v59 }
  0xb8   :  { %v1293_v56 = vpack.c.bf16 %v1289_v55, %v1289_v55  ;;  %v1212_v19 = vsel %vm255_vm5, %v2506_v6, %v2507_v25  ;;  %v1213_v13 = vsel %vm255_vm5, %v2507_v25, %v2506_v6  ;;  %v2522_v33 = vunpack.i.h.bf16 %v2520_v54 }
  0xb9   :  { %v368_v41 = vrot.slane %v2266_v31, 6  ;;  %v2260_v50 = vcombine.low %v282_v17, %v283_v32  ;;  %v1315_v63 = vmul.bf16 %v3115_v62, %v1292_v16  ;;  %v1215_v49 = vpack.c.bf16 %v1213_v13, %v1213_v13  ;;  %v2530_v52 = vpop.permute.xlu1 %2529  ;;  %v2525_v45 = vpop.permute.xlu0 %2524  ;;  %v3837_v62 = vld [vmem:[#allocation14_spill] sm:$0xff]  ;;  %v3838_v13 = vld [vmem:[#allocation15_spill] sm:$0xff] }
  0xba   :  { %v1316_v60 = vmul.bf16 %v3118_v10, %v1293_v56  ;;  %v1216_v7 = vpack.c.bf16 %v1212_v19, %v1212_v19  ;;  %v2521_v61 = vunpack.i.l.bf16 %v2520_v54  ;;  %v2517_v8 = vunpack.i.h.bf16 %v2515_v30  ;;  %v2728_v11 = vld [vmem:[#allocation2 + $0x4] ss:$16 sps:$4 sm:$0xff]   ;;  %v2730_v48 = vld [vmem:[#allocation2] ss:$16 sps:$4 sm:$0xff]  }
  0xbb   :  { %370 = vst [vmem:[#allocation2 + $0x30] sm:$0xcc] %v368_v41  ;;  %v289_v51 = vrot.slane %v2260_v50, 6  ;;  %v1238_v47 = vmul.bf16 %v3836_v39, %v1215_v49  ;;  %v2516_v40 = vunpack.i.l.bf16 %v2515_v30  ;;  %v2532_v38 = vunpack.i.h.bf16 %v2530_v52  ;;  %2122 = vmatprep.subr.bf16.mxu0 %v2728_v11 }
  0xbc   :  { %v2339_v15 = vcombine.low %v1315_v63, %v1316_v60  ;;  %v1239_v4 = vmul.bf16 %v3837_v62, %v1216_v7  ;;  %v297_v44 = vsel %vm296_vm6, %v2521_v61, %v2522_v33  ;;  %v298_v10 = vsel %vm296_vm6, %v2522_v33, %v2521_v61  ;;  %2123 = vmatpush1.bf16.msra.mxu0 %v2730_v48  ;;  %v3841_v62 = vld [vmem:[#allocation19_spill] sm:$0xff] }
  0xbd   :  { %291 = vst [vmem:[#allocation2 + $0x20] sm:$0xcc] %v289_v51  ;;  %v300_v43 = vpack.c.bf16 %v298_v10, %v298_v10  ;;  %v301_v26 = vpack.c.bf16 %v297_v44, %v297_v44  ;;  %v218_v0 = vsel %vm217_vm7, %v2516_v40, %v2517_v8  ;;  %v219_v14 = vsel %vm217_vm7, %v2517_v8, %v2516_v40  ;;  %v2540_v35 = vpop.permute.xlu1 %2539  ;;  %v2535_v42 = vpop.permute.xlu0 %2534  ;;  %v3839_v51 = vld [vmem:[#allocation16_spill] sm:$0xff] }
  0xbe   :  { %v1322_v54 = vrot.slane %v2339_v15, 6  ;;  %v2333_v30 = vcombine.low %v1238_v47, %v1239_v4  ;;  %v221_v55 = vpack.c.bf16 %v219_v14, %v219_v14  ;;  %v222_v59 = vpack.c.bf16 %v218_v0, %v218_v0  ;;  %v2735_v25 = vld [vmem:[#allocation2 + $0xc] ss:$16 sps:$4 sm:$0xff]   ;;  %v2737_v6 = vld [vmem:[#allocation2 + $0x8] ss:$16 sps:$4 sm:$0xff]  }
  0xbf   :  { %v321_v31 = vmul.bf16 %v3133_v12, %v300_v43  ;;  %v322_v17 = vmul.bf16 %v3136_v22, %v301_v26  ;;  %v2531_v32 = vunpack.i.l.bf16 %v2530_v52  ;;  %v2527_v16 = vunpack.i.h.bf16 %v2525_v45  ;;  %2163 = vmatprep.subr.bf16.mxu1 %v2735_v25  ;;  %v3840_v47 = vld [vmem:[#allocation17_spill] sm:$0xff] }
  0xc0   :  { %1324 = vst [vmem:[#allocation2 + $0x38] sm:$0xcc] %v1322_v54  ;;  %v1245_v56 = vrot.slane %v2333_v30, 6  ;;  %v242_v19 = vmul.bf16 %v3139_v24, %v221_v55  ;;  %v243_v33 = vmul.bf16 %v3838_v13, %v222_v59  ;;  %v2526_v41 = vunpack.i.l.bf16 %v2525_v45  ;;  %2164 = vmatpush1.bf16.msra.mxu1 %v2737_v6 }
  0xc1   :  { %v2263_v50 = vcombine.low %v321_v31, %v322_v17  ;;  %v1252_v63 = vsel %vm296_vm6, %v2531_v32, %v2532_v38  ;;  %v1253_v49 = vsel %vm296_vm6, %v2532_v38, %v2531_v32  ;;  %v2542_v12 = vunpack.i.h.bf16 %v2540_v35  ;;  %v2550_v22 = vpop.permute.xlu1 %2549  ;;  %v2545_v52 = vpop.permute.xlu0 %2544  ;;  %v3843_v17 = vld [vmem:[#allocation20_spill] sm:$0xff] }
  0xc2   :  { %1247 = vst [vmem:[#allocation2 + $0x28] sm:$0xcc] %v1245_v56  ;;  %v2257_v60 = vcombine.low %v242_v19, %v243_v33  ;;  %v1255_v7 = vpack.c.bf16 %v1253_v49, %v1253_v49  ;;  %v1256_v61 = vpack.c.bf16 %v1252_v63, %v1252_v63  ;;  %v1175_v24 = vsel %vm217_vm7, %v2526_v41, %v2527_v16 }
  0xc3   :  { %329 = vst [vmem:[#allocation2 + $0x30] sm:$0x33] %v2263_v50  ;;  %v1176_v45 = vsel %vm217_vm7, %v2527_v16, %v2526_v41  ;;  %v1179_v8 = vpack.c.bf16 %v1175_v24, %v1175_v24  ;;  %v2541_v11 = vunpack.i.l.bf16 %v2540_v35  ;;  %v2537_v48 = vunpack.i.h.bf16 %v2535_v42  ;;  %v3842_v35 = vld [vmem:[#allocation18_spill] sm:$0xff]  ;;  %v3844_v16 = vld [vmem:[#allocation21_spill] sm:$0xff]  ;;  %v3846_v24 = vld [vmem:[#allocation23_spill] sm:$0xff] }
  0xc4   :  { %250 = vst [vmem:[#allocation2 + $0x20] sm:$0x33] %v2257_v60  ;;  %v1276_v39 = vmul.bf16 %v3839_v51, %v1255_v7  ;;  %v1277_v40 = vmul.bf16 %v3840_v47, %v1256_v61  ;;  %v1178_v38 = vpack.c.bf16 %v1176_v45, %v1176_v45  ;;  %v2536_v15 = vunpack.i.l.bf16 %v2535_v42  ;;  %v3847_v47 = vld [vmem:[#allocation24_spill] sm:$0xff] }
  0xc5   :  { %v1200_v4 = vmul.bf16 %v3841_v62, %v1179_v8  ;;  %v493_v44 = vsel %vm492_vm8, %v2541_v11, %v2542_v12  ;;  %v494_v10 = vsel %vm492_vm8, %v2542_v12, %v2541_v11  ;;  %v2552_v43 = vunpack.i.h.bf16 %v2550_v22  ;;  %v2560_v26 = vpop.permute.xlu1 %2559  ;;  %v2555_v0 = vpop.permute.xlu0 %2554 }
  0xc6   :  { %v2336_v14 = vcombine.low %v1276_v39, %v1277_v40  ;;  %v1199_v54 = vmul.bf16 %v3842_v35, %v1178_v38  ;;  %v496_v30 = vpack.c.bf16 %v494_v10, %v494_v10  ;;  %v497_v42 = vpack.c.bf16 %v493_v44, %v493_v44  ;;  %v3848_v38 = vld [vmem:[#allocation25_spill] sm:$0xff] }
  0xc7   :  { %v414_v55 = vsel %vm413_vm9, %v2536_v15, %v2537_v48  ;;  %v415_v59 = vsel %vm413_vm9, %v2537_v48, %v2536_v15  ;;  %v2551_v25 = vunpack.i.l.bf16 %v2550_v22  ;;  %v2547_v6 = vunpack.i.h.bf16 %v2545_v52  ;;  %v3845_v22 = vld [vmem:[#allocation22_spill] sm:$0xff] }
  0xc8   :  { %1284 = vst [vmem:[#allocation2 + $0x38] sm:$0x33] %v2336_v14  ;;  %v2330_v31 = vcombine.low %v1199_v54, %v1200_v4  ;;  %v519_v32 = vmul.bf16 %v3843_v17, %v496_v30  ;;  %v520_v56 = vmul.bf16 %v3844_v16, %v497_v42  ;;  %v417_v19 = vpack.c.bf16 %v415_v59, %v415_v59  ;;  %v3849_v30 = vld [vmem:[#allocation26_spill] sm:$0xff] }
  0xc9   :  { %v418_v13 = vpack.c.bf16 %v414_v55, %v414_v55  ;;  %v1443_v33 = vsel %vm492_vm8, %v2551_v25, %v2552_v43  ;;  %v1444_v41 = vsel %vm492_vm8, %v2552_v43, %v2551_v25  ;;  %v2546_v50 = vunpack.i.l.bf16 %v2545_v52  ;;  %v2570_v63 = vpop.permute.xlu1 %2569  ;;  %v3494_v49 = vpop.permute.xlu0 %2564 }
  0xca   :  { %1207 = vst [vmem:[#allocation2 + $0x28] sm:$0x33] %v2330_v31  ;;  %v2278_v12 = vcombine.low %v519_v32, %v520_v56  ;;  %v440_v60 = vmul.bf16 %v3845_v22, %v417_v19  ;;  %v1446_v7 = vpack.c.bf16 %v1444_v41, %v1444_v41  ;;  %v1447_v61 = vpack.c.bf16 %v1443_v33, %v1443_v33 }
  0xcb   :  { %v441_v45 = vmul.bf16 %v3846_v24, %v418_v13  ;;  %v1366_v8 = vsel %vm413_vm9, %v2546_v50, %v2547_v6  ;;  %v1367_v11 = vsel %vm413_vm9, %v2547_v6, %v2546_v50  ;;  %v2562_v48 = vunpack.i.h.bf16 %v2560_v26  ;;  %v2750_v51 = vld [vmem:[#allocation2 + $0x24] ss:$16 sps:$4 sm:$0xff]   ;;  %v2752_v52 = vld [vmem:[#allocation2 + $0x20] ss:$16 sps:$4 sm:$0xff]   ;;  %v3850_v6 = vld [vmem:[#allocation27_spill] sm:$0xff] }
  0xcc   :  { %v526_v39 = vrot.slane %v2278_v12, 6  ;;  %v1469_v40 = vmul.bf16 %v3847_v47, %v1446_v7  ;;  %v1470_v15 = vmul.bf16 %v3848_v38, %v1447_v61  ;;  %v1369_v62 = vpack.c.bf16 %v1367_v11, %v1367_v11  ;;  %2124 = vmatprep.subr.bf16.mxu0 %v2750_v51  ;;  %v3851_v61 = vld [vmem:[#allocation28_spill] sm:$0xff]  ;;  %v3853_v47 = vld [vmem:[#allocation29_spill] sm:$0xff] }
  0xcd   :  { %v2272_v4 = vcombine.low %v440_v60, %v441_v45  ;;  %v1370_v44 = vpack.c.bf16 %v1366_v8, %v1366_v8  ;;  %v2561_v10 = vunpack.i.l.bf16 %v2560_v26  ;;  %v2557_v43 = vunpack.i.h.bf16 %v2555_v0  ;;  %v2580_v14 = vpop.permute.xlu1 %2579  ;;  %v3505_v35 = vpop.permute.xlu0 %2574  ;;  %2125 = vmatpush1.bf16.msra.mxu0 %v2752_v52 }
  0xce   :  { %528 = vst [vmem:[#allocation2 + $0x50] sm:$0xcc] %v526_v39  ;;  %v2351_v54 = vcombine.low %v1469_v40, %v1470_v15  ;;  %v1392_v42 = vmul.bf16 %v3849_v30, %v1369_v62  ;;  %v2556_v55 = vunpack.i.l.bf16 %v2555_v0  ;;  %v2572_v59 = vunpack.i.h.bf16 %v2570_v63  ;;  %v3854_v30 = vld [vmem:[#allocation31_spill] sm:$0xff] }
  0xcf   :  { %v447_v25 = vrot.slane %v2272_v4, 6  ;;  %v1393_v31 = vmul.bf16 %v3850_v6, %v1370_v44  ;;  %v455_v26 = vsel %vm454_vm10, %v2561_v10, %v2562_v48  ;;  %v456_v17 = vsel %vm454_vm10, %v2562_v48, %v2561_v10  ;;  %v3852_v48 = vld [vmem:[#allocation30_spill] sm:$0xff] }
  0xd0   :  { %v1476_v32 = vrot.slane %v2351_v54, 6  ;;  %v458_v16 = vpack.c.bf16 %v456_v17, %v456_v17  ;;  %v459_v56 = vpack.c.bf16 %v455_v26, %v455_v26  ;;  %v376_v19 = vsel %vm375_vm11, %v2556_v55, %v2557_v43 }
  0xd1   :  { %449 = vst [vmem:[#allocation2 + $0x40] sm:$0xcc] %v447_v25  ;;  %v2345_v0 = vcombine.low %v1392_v42, %v1393_v31  ;;  %v377_v13 = vsel %vm375_vm11, %v2557_v43, %v2556_v55  ;;  %v380_v33 = vpack.c.bf16 %v376_v19, %v376_v19  ;;  %v2571_v41 = vunpack.i.l.bf16 %v2570_v63  ;;  %v2757_v50 = vld [vmem:[#allocation2 + $0x2c] ss:$16 sps:$4 sm:$0xff]   ;;  %v2759_v12 = vld [vmem:[#allocation2 + $0x28] ss:$16 sps:$4 sm:$0xff]   ;;  %v3518_v22 = vpop.permute.xlu1 %2589  ;;  %v3520_v60 = vpop.permute.xlu0 %2584 }
  0xd2   :  { %1478 = vst [vmem:[#allocation2 + $0x58] sm:$0xcc] %v1476_v32  ;;  %v479_v7 = vmul.bf16 %v3187_v9, %v458_v16  ;;  %v480_v24 = vmul.bf16 %v3851_v61, %v459_v56  ;;  %v379_v45 = vpack.c.bf16 %v377_v13, %v377_v13  ;;  %v2567_v8 = vunpack.i.h.bf16 %v3494_v49  ;;  %2165 = vmatprep.subr.bf16.mxu1 %v2757_v50  ;;  %v3855_v55 = vld [vmem:[#allocation32_spill] sm:$0xff]  ;;  %v3858_v61 = vld [vmem:[#allocation35_spill] sm:$0xff] }
  0xd3   :  { %v1399_v11 = vrot.slane %v2345_v0, 6  ;;  %v401_v51 = vmul.bf16 %v3852_v48, %v380_v33  ;;  %v1406_v63 = vsel %vm454_vm10, %v2571_v41, %v2572_v59  ;;  %v1407_v52 = vsel %vm454_vm10, %v2572_v59, %v2571_v41  ;;  %2166 = vmatpush1.bf16.msra.mxu1 %v2759_v12  ;;  %v3856_v41 = vld [vmem:[#allocation33_spill] sm:$0xff]  ;;  %v3857_v12 = vld [vmem:[#allocation34_spill] sm:$0xff] }
  0xd4   :  { %v2275_v39 = vcombine.low %v479_v7, %v480_v24  ;;  %v400_v40 = vmul.bf16 %v3853_v47, %v379_v45  ;;  %v1409_v38 = vpack.c.bf16 %v1407_v52, %v1407_v52  ;;  %v1410_v9 = vpack.c.bf16 %v1406_v63, %v1406_v63 }
  0xd5   :  { %1401 = vst [vmem:[#allocation2 + $0x48] sm:$0xcc] %v1399_v11  ;;  %v2566_v15 = vunpack.i.l.bf16 %v3494_v49  ;;  %v2582_v62 = vunpack.i.h.bf16 %v2580_v14  ;;  %v2581_v4 = vunpack.i.l.bf16 %v2580_v14  ;;  %v2577_v44 = vunpack.i.h.bf16 %v3505_v35  ;;  %v3533_v10 = vpop.permute.xlu1 %2599  ;;  %v3535_v43 = vpop.permute.xlu0 %2594 }
  0xd6   :  { %487 = vst [vmem:[#allocation2 + $0x50] sm:$0x33] %v2275_v39  ;;  %v2269_v54 = vcombine.low %v400_v40, %v401_v51  ;;  %v1430_v42 = vmul.bf16 %v3854_v30, %v1409_v38  ;;  %v1431_v59 = vmul.bf16 %v3855_v55, %v1410_v9  ;;  %v2576_v25 = vunpack.i.l.bf16 %v3505_v35  ;;  %v3860_v39 = vld [vmem:[#allocation37_spill] sm:$0xff] }
  0xd7   :  { %v1329_v6 = vsel %vm375_vm11, %v2566_v15, %v2567_v8  ;;  %v1330_v49 = vsel %vm375_vm11, %v2567_v8, %v2566_v15  ;;  %v620_v14 = vsel %vm619_vm12, %v2581_v4, %v2582_v62  ;;  %v621_v31 = vsel %vm619_vm12, %v2582_v62, %v2581_v4  ;;  %v3859_v8 = vld [vmem:[#allocation36_spill] sm:$0xff]  ;;  %v3861_v15 = vld [vmem:[#allocation38_spill] sm:$0xff] }
  0xd8   :  { %408 = vst [vmem:[#allocation2 + $0x40] sm:$0x33] %v2269_v54  ;;  %v2348_v26 = vcombine.low %v1430_v42, %v1431_v59  ;;  %v1332_v17 = vpack.c.bf16 %v1330_v49, %v1330_v49  ;;  %v1333_v32 = vpack.c.bf16 %v1329_v6, %v1329_v6  ;;  %v623_v16 = vpack.c.bf16 %v620_v14, %v620_v14 }
  0xd9   :  { %v624_v35 = vpack.c.bf16 %v621_v31, %v621_v31  ;;  %v541_v56 = vsel %vm540_vm13, %v2576_v25, %v2577_v44  ;;  %v542_v19 = vsel %vm540_vm13, %v2577_v44, %v2576_v25  ;;  %v2592_v0 = vunpack.i.h.bf16 %v3518_v22  ;;  %v3554_v13 = vpop.permute.xlu1 %2609  ;;  %v3556_v33 = vpop.permute.xlu0 %2604 }
  0xda   :  { %1438 = vst [vmem:[#allocation2 + $0x58] sm:$0x33] %v2348_v26  ;;  %v1353_v50 = vmul.bf16 %v3856_v41, %v1332_v17  ;;  %v1354_v7 = vmul.bf16 %v3857_v12, %v1333_v32  ;;  %v646_v24 = vmul.bf16 %v3858_v61, %v623_v16  ;;  %v544_v45 = vpack.c.bf16 %v541_v56, %v541_v56  ;;  %v3862_v17 = vld [vmem:[#allocation39_spill] sm:$0xff]  ;;  %v3864_v41 = vld [vmem:[#allocation41_spill] sm:$0xff] }
  0xdb   :  { %v647_v11 = vmul.bf16 %v3859_v8, %v624_v35  ;;  %v545_v48 = vpack.c.bf16 %v542_v19, %v542_v19  ;;  %v2591_v51 = vunpack.i.l.bf16 %v3518_v22  ;;  %v2587_v63 = vunpack.i.h.bf16 %v3520_v60  ;;  %v3863_v19 = vld [vmem:[#allocation40_spill] sm:$0xff] }
  0xdc   :  { %v2342_v52 = vcombine.low %v1353_v50, %v1354_v7  ;;  %v567_v47 = vmul.bf16 %v3860_v39, %v544_v45  ;;  %v2586_v40 = vunpack.i.l.bf16 %v3520_v60  ;;  %v2602_v38 = vunpack.i.h.bf16 %v3533_v10 }
  0xdd   :  { %v2288_v9 = vcombine.low %v646_v24, %v647_v11  ;;  %v568_v62 = vmul.bf16 %v3861_v15, %v545_v48  ;;  %v1567_v4 = vsel %vm619_vm12, %v2591_v51, %v2592_v0  ;;  %v1568_v22 = vsel %vm619_vm12, %v2592_v0, %v2591_v51  ;;  %v3573_v44 = vpop.permute.xlu1 %2619  ;;  %v3575_v54 = vpop.permute.xlu0 %2614 }
  0xde   :  { %1361 = vst [vmem:[#allocation2 + $0x48] sm:$0x33] %v2342_v52  ;;  %v1570_v30 = vpack.c.bf16 %v1567_v4, %v1567_v4  ;;  %v1571_v42 = vpack.c.bf16 %v1568_v22, %v1568_v22  ;;  %v1490_v60 = vsel %vm540_vm13, %v2586_v40, %v2587_v63  ;;  %v1491_v55 = vsel %vm540_vm13, %v2587_v63, %v2586_v40  ;;  %v3865_v40 = vld [vmem:[#allocation42_spill] sm:$0xff] }
  0xdf   :  { %v653_v59 = vrot.slane %v2288_v9, 6  ;;  %v2282_v25 = vcombine.low %v567_v47, %v568_v62  ;;  %v1493_v6 = vpack.c.bf16 %v1490_v60, %v1490_v60  ;;  %v1494_v49 = vpack.c.bf16 %v1491_v55, %v1491_v55  ;;  %v2772_v14 = vld [vmem:[#allocation2 + $0x44] ss:$16 sps:$4 sm:$0xff]   ;;  %v2774_v31 = vld [vmem:[#allocation2 + $0x40] ss:$16 sps:$4 sm:$0xff]   ;;  %v3866_v9 = vld [vmem:[#allocation43_spill] sm:$0xff] }
  0xe0   :  { %vm698_vm0 = vcmp.lt.s32.totalorder %v3273_v27, 112  ;;  %v1593_v26 = vmul.bf16 %v3233_v29, %v1570_v30  ;;  %v1594_v32 = vmul.bf16 %v3862_v17, %v1571_v42  ;;  %v2601_v16 = vunpack.i.l.bf16 %v3533_v10  ;;  %2126 = vmatprep.subr.bf16.mxu0 %v2772_v14  ;;  %v3867_v30 = vld [vmem:[#allocation44_spill] sm:$0xff] }
  0xe1   :  { %v2597_v35 = vunpack.i.h.bf16 %v3535_v43  ;;  %655 = vst [vmem:[#allocation2 + $0x70] sm:$0xcc] %v653_v59  ;;  %v574_v56 = vrot.slane %v2282_v25, 6  ;;  %v1516_v0 = vmul.bf16 %v3863_v19, %v1493_v6  ;;  %v1517_v50 = vmul.bf16 %v3864_v41, %v1494_v49  ;;  %2127 = vmatpush1.bf16.msra.mxu0 %v2774_v31  ;;  %v3594_v24 = vpop.permute.xlu1 %2629  ;;  %v3598_v48 = vpop.permute.xlu0 %2624  ;;  %v3868_v25 = vld [vmem:[#allocation45_spill] sm:$0xff] }
  0xe2   :  { %v2596_v12 = vunpack.i.l.bf16 %v3535_v43  ;;  %v2361_v7 = vcombine.low %v1593_v26, %v1594_v32  ;;  %v1530_v61 = vsel %vm581_vm14, %v2601_v16, %v2602_v38  ;;  %v1531_v29 = vsel %vm581_vm14, %v2602_v38, %v2601_v16 }
  0xe3   :  { %v2612_v10 = vunpack.i.h.bf16 %v3554_v13  ;;  %576 = vst [vmem:[#allocation2 + $0x60] sm:$0xcc] %v574_v56  ;;  %v2355_v45 = vcombine.low %v1516_v0, %v1517_v50  ;;  %v1533_v8 = vpack.c.bf16 %v1530_v61, %v1530_v61  ;;  %v1534_v11 = vpack.c.bf16 %v1531_v29, %v1531_v29  ;;  %v3869_v56 = vld [vmem:[#allocation46_spill] sm:$0xff]  ;;  %v3870_v0 = vld [vmem:[#allocation47_spill] sm:$0xff] }
  0xe4   :  { %v582_v43 = vsel %vm581_vm14, %v2596_v12, %v2597_v35  ;;  %v1600_v51 = vrot.slane %v2361_v7, 6  ;;  %v583_v63 = vsel %vm581_vm14, %v2597_v35, %v2596_v12  ;;  %v2611_v39 = vunpack.i.l.bf16 %v3554_v13 }
  0xe5   :  { %v585_v52 = vpack.c.bf16 %v582_v43, %v582_v43  ;;  %v1523_v47 = vrot.slane %v2355_v45, 6  ;;  %v1554_v38 = vmul.bf16 %v3865_v40, %v1533_v8  ;;  %v1555_v15 = vmul.bf16 %v3866_v9, %v1534_v11  ;;  %v2779_v4 = vld [vmem:[#allocation2 + $0x4c] ss:$16 sps:$4 sm:$0xff]   ;;  %v2781_v22 = vld [vmem:[#allocation2 + $0x48] ss:$16 sps:$4 sm:$0xff]   ;;  %v3618_v16 = vpop.permute.xlu1 %2639  ;;  %v3623_v12 = vpop.permute.xlu0 %2634 }
  0xe6   :  { %v586_v62 = vpack.c.bf16 %v583_v63, %v583_v63  ;;  %vm739_vm1 = vcmp.lt.s32.totalorder %v3273_v27, 111  ;;  %1602 = vst [vmem:[#allocation2 + $0x78] sm:$0xcc] %v1600_v51  ;;  %v778_v60 = vsel %vm777_vm15, %v2611_v39, %v2612_v10  ;;  %v779_v55 = vsel %vm777_vm15, %v2612_v10, %v2611_v39  ;;  %2167 = vmatprep.subr.bf16.mxu1 %v2779_v4 }
  0xe7   :  { %v606_v42 = vmul.bf16 %v3867_v30, %v585_v52  ;;  %v2607_v13 = vunpack.i.h.bf16 %v3556_v33  ;;  %vm660_vm2 = vcmp.lt.s32.totalorder %v3273_v27, 113  ;;  %1525 = vst [vmem:[#allocation2 + $0x68] sm:$0xcc] %v1523_v47  ;;  %v2358_v59 = vcombine.low %v1554_v38, %v1555_v15  ;;  %2168 = vmatpush1.bf16.msra.mxu1 %v2781_v22  ;;  %v3871_v52 = vld [vmem:[#allocation48_spill] sm:$0xff]  ;;  %v3872_v47 = vld [vmem:[#allocation49_spill] sm:$0xff]  ;;  %v3873_v38 = vld [vmem:[#allocation50_spill] sm:$0xff] }
  0xe8   :  { %v607_v6 = vmul.bf16 %v3868_v25, %v586_v62  ;;  %v781_v49 = vpack.c.bf16 %v778_v60, %v778_v60  ;;  %v782_v14 = vpack.c.bf16 %v779_v55, %v779_v55  ;;  %v2606_v31 = vunpack.i.l.bf16 %v3556_v33  ;;  %v3874_v15 = vld [vmem:[#allocation51_spill] sm:$0xff] }
  0xe9   :  { %v2622_v26 = vunpack.i.h.bf16 %v3573_v44  ;;  %v2621_v17 = vunpack.i.l.bf16 %v3573_v44  ;;  %v2617_v32 = vunpack.i.h.bf16 %v3575_v54  ;;  %1562 = vst [vmem:[#allocation2 + $0x78] sm:$0x33] %v2358_v59  ;;  %v2616_v50 = vunpack.i.l.bf16 %v3575_v54  ;;  %v3649_v25 = vpop.permute.xlu0 %2644 }
  0xea   :  { %v2285_v35 = vcombine.low %v606_v42, %v607_v6  ;;  %v804_v19 = vmul.bf16 %v3869_v56, %v781_v49  ;;  %v805_v41 = vmul.bf16 %v3870_v0, %v782_v14  ;;  %v699_v33 = vsel %vm698_vm0, %v2606_v31, %v2607_v13  ;;  %v3643_v42 = vpop.permute.xlu1 %2649  ;;  %v3875_v49 = vld [vmem:[#allocation52_spill] sm:$0xff] }
  0xeb   :  { %v700_v44 = vsel %vm698_vm0, %v2607_v13, %v2606_v31  ;;  %v1721_v7 = vsel %vm777_vm15, %v2621_v17, %v2622_v26  ;;  %v1722_v61 = vsel %vm777_vm15, %v2622_v26, %v2621_v17  ;;  %v702_v10 = vpack.c.bf16 %v699_v33, %v699_v33 }
  0xec   :  { %614 = vst [vmem:[#allocation2 + $0x70] sm:$0x33] %v2285_v35  ;;  %v2300_v29 = vcombine.low %v804_v19, %v805_v41  ;;  %v703_v45 = vpack.c.bf16 %v700_v44, %v700_v44  ;;  %v1724_v8 = vpack.c.bf16 %v1721_v7, %v1721_v7  ;;  %v1725_v54 = vpack.c.bf16 %v1722_v61, %v1722_v61 }
  0xed   :  { %v1644_v11 = vsel %vm698_vm0, %v2616_v50, %v2617_v32  ;;  %v1645_v43 = vsel %vm698_vm0, %v2617_v32, %v2616_v50  ;;  %v2632_v51 = vunpack.i.h.bf16 %v3594_v24  ;;  %v725_v39 = vmul.bf16 %v3871_v52, %v702_v10  ;;  %v3878_v52 = vld [vmem:[#allocation55_spill] sm:$0xff] }
  0xee   :  { %v811_v63 = vrot.slane %v2300_v29, 6  ;;  %v726_v40 = vmul.bf16 %v3872_v47, %v703_v45  ;;  %v1747_v9 = vmul.bf16 %v3873_v38, %v1724_v8  ;;  %v1748_v62 = vmul.bf16 %v3874_v15, %v1725_v54  ;;  %v3876_v45 = vld [vmem:[#allocation53_spill] sm:$0xff]  ;;  %v2655_v47 = vpop.permute.xlu0 %2654 }
  0xef   :  { %v1647_v4 = vpack.c.bf16 %v1644_v11, %v1644_v11  ;;  %v1648_v22 = vpack.c.bf16 %v1645_v43, %v1645_v43  ;;  %v2631_v30 = vunpack.i.l.bf16 %v3594_v24  ;;  %v2627_v55 = vunpack.i.h.bf16 %v3598_v48  ;;  %v2660_v43 = vpop.permute.xlu1 %2659 }
  0xf0   :  { %813 = vst [vmem:[#allocation2 + $0x90] sm:$0xcc] %v811_v63  ;;  %v2294_v60 = vcombine.low %v725_v39, %v726_v40  ;;  %v2626_v13 = vunpack.i.l.bf16 %v3598_v48  ;;  %v2642_v59 = vunpack.i.h.bf16 %v3618_v16  ;;  %vm935_vm3 = vcmp.lt.s32.totalorder %v3273_v27, 95  ;;  %v2796_v26 = vld [vmem:[#allocation2 + $0x6c] ss:$16 sps:$4 sm:$0xff]  }
  0xf1   :  { %v2373_v6 = vcombine.low %v1747_v9, %v1748_v62  ;;  %v1670_v14 = vmul.bf16 %v3875_v49, %v1647_v4  ;;  %v1671_v31 = vmul.bf16 %v3285_v18, %v1648_v22  ;;  %v740_v24 = vsel %vm739_vm1, %v2631_v30, %v2632_v51  ;;  %v2799_v17 = vld [vmem:[#allocation2 + $0x68] ss:$16 sps:$4 sm:$0xff]   ;;  %2169 = vmatprep.subr.bf16.mxu1 %v2796_v26  ;;  %v3881_v49 = vld [vmem:[#allocation58_spill] sm:$0xff] }
  0xf2   :  { %vm856_vm4 = vcmp.lt.s32.totalorder %v3273_v27, 97  ;;  %v732_v32 = vrot.slane %v2294_v60, 6  ;;  %v741_v48 = vsel %vm739_vm1, %v2632_v51, %v2631_v30  ;;  %v743_v35 = vpack.c.bf16 %v740_v24, %v740_v24  ;;  %2170 = vmatpush1.bf16.msra.mxu1 %v2799_v17  ;;  %v3877_v51 = vld [vmem:[#allocation54_spill] sm:$0xff]  ;;  %v3879_v30 = vld [vmem:[#allocation56_spill] sm:$0xff] }
  0xf3   :  { %v661_v56 = vsel %vm660_vm2, %v2626_v13, %v2627_v55  ;;  %v1754_v19 = vrot.slane %v2373_v6, 6  ;;  %v2367_v0 = vcombine.low %v1670_v14, %v1671_v31  ;;  %v744_v41 = vpack.c.bf16 %v741_v48, %v741_v48  ;;  %v2794_v50 = vld [vmem:[#allocation2 + $0x64] ss:$16 sps:$4 sm:$0xff]   ;;  %v2798_v33 = vld [vmem:[#allocation2 + $0x60] ss:$16 sps:$4 sm:$0xff]  }
  0xf4   :  { %v662_v18 = vsel %vm660_vm2, %v2627_v55, %v2626_v13  ;;  %734 = vst [vmem:[#allocation2 + $0x80] sm:$0xcc] %v732_v32  ;;  %v764_v44 = vmul.bf16 %v3288_v46, %v743_v35  ;;  %v664_v7 = vpack.c.bf16 %v661_v56, %v661_v56  ;;  %v2641_v29 = vunpack.i.l.bf16 %v3618_v16  ;;  %2128 = vmatprep.subr.bf16.mxu0 %v2794_v50  ;;  %v3880_v55 = vld [vmem:[#allocation57_spill] sm:$0xff]  ;;  %v3882_v32 = vld [vmem:[#allocation59_spill] sm:$0xff] }
  0xf5   :  { %v665_v61 = vpack.c.bf16 %v662_v18, %v662_v18  ;;  %1756 = vst [vmem:[#allocation2 + $0x98] sm:$0xcc] %v1754_v19  ;;  %v1677_v10 = vrot.slane %v2367_v0, 6  ;;  %v765_v8 = vmul.bf16 %v3876_v45, %v744_v41  ;;  %v2637_v54 = vunpack.i.h.bf16 %v3623_v12  ;;  %2129 = vmatpush1.bf16.msra.mxu0 %v2798_v33  ;;  %v2665_v18 = vpop.permute.xlu0 %2664 }
  0xf6   :  { %v2636_v11 = vunpack.i.l.bf16 %v3623_v12  ;;  %v685_v63 = vmul.bf16 %v3877_v51, %v664_v7  ;;  %v1684_v46 = vsel %vm739_vm1, %v2641_v29, %v2642_v59  ;;  %v1685_v16 = vsel %vm739_vm1, %v2642_v59, %v2641_v29 }
  0xf7   :  { %v686_v39 = vmul.bf16 %v3878_v52, %v665_v61  ;;  %1679 = vst [vmem:[#allocation2 + $0x88] sm:$0xcc] %v1677_v10  ;;  %v2297_v40 = vcombine.low %v764_v44, %v765_v8  ;;  %v1687_v38 = vpack.c.bf16 %v1684_v46, %v1684_v46  ;;  %v1688_v9 = vpack.c.bf16 %v1685_v16, %v1685_v16  ;;  %v3883_v61 = vld [vmem:[#allocation60_spill] sm:$0xff]  ;;  %v3884_v10 = vld [vmem:[#allocation61_spill] sm:$0xff] }
  0xf8   :  { %v1607_v12 = vsel %vm660_vm2, %v2636_v11, %v2637_v54  ;;  %v1608_v62 = vsel %vm660_vm2, %v2637_v54, %v2636_v11  ;;  %v2652_v22 = vunpack.i.h.bf16 %v3643_v42  ;;  %v2651_v6 = vunpack.i.l.bf16 %v3643_v42  ;;  %v2670_v42 = vpop.permute.xlu1 %2669  ;;  %v3885_v11 = vld [vmem:[#allocation62_spill] sm:$0xff] }
  0xf9   :  { %v2291_v15 = vcombine.low %v685_v63, %v686_v39  ;;  %v1610_v4 = vpack.c.bf16 %v1607_v12, %v1607_v12  ;;  %772 = vst [vmem:[#allocation2 + $0x90] sm:$0x33] %v2297_v40  ;;  %v1708_v60 = vmul.bf16 %v3879_v30, %v1687_v38  ;;  %v1709_v13 = vmul.bf16 %v3880_v55, %v1688_v9  ;;  %v2675_v55 = vpop.permute.xlu0 %2674 }
  0xfa   :  { %v1611_v59 = vpack.c.bf16 %v1608_v62, %v1608_v62  ;;  %v2647_v31 = vunpack.i.h.bf16 %v3649_v25  ;;  %v2646_v24 = vunpack.i.l.bf16 %v3649_v25  ;;  %v2662_v26 = vunpack.i.h.bf16 %v2660_v43 }
  0xfb   :  { %693 = vst [vmem:[#allocation2 + $0x80] sm:$0x33] %v2291_v15  ;;  %v1631_v14 = vmul.bf16 %v3881_v49, %v1610_v4  ;;  %vm897_vm5 = vcmp.lt.s32.totalorder %v3273_v27, 96  ;;  %v2370_v17 = vcombine.low %v1708_v60, %v1709_v13  ;;  %v936_v35 = vsel %vm935_vm3, %v2651_v6, %v2652_v22 }
  0xfc   :  { %v1632_v48 = vmul.bf16 %v3882_v32, %v1611_v59  ;;  %v937_v56 = vsel %vm935_vm3, %v2652_v22, %v2651_v6  ;;  %v939_v19 = vpack.c.bf16 %v936_v35, %v936_v35  ;;  %v857_v41 = vsel %vm856_vm4, %v2646_v24, %v2647_v31  ;;  %v2680_v15 = vpop.permute.xlu1 %2679 }
  0xfd   :  { %v940_v0 = vpack.c.bf16 %v937_v56, %v937_v56  ;;  %v858_v25 = vsel %vm856_vm4, %v2647_v31, %v2646_v24  ;;  %vm818_vm6 = vcmp.lt.s32.totalorder %v3273_v27, 98  ;;  %1716 = vst [vmem:[#allocation2 + $0x98] sm:$0x33] %v2370_v17  ;;  %v860_v33 = vpack.c.bf16 %v857_v41, %v857_v41 }
  0xfe   :  { %v2364_v50 = vcombine.low %v1631_v14, %v1632_v48  ;;  %v861_v44 = vpack.c.bf16 %v858_v25, %v858_v25  ;;  %v2661_v7 = vunpack.i.l.bf16 %v2660_v43  ;;  %v962_v29 = vmul.bf16 %v3883_v61, %v939_v19 }
  0xff   :  { %v963_v45 = vmul.bf16 %v3884_v10, %v940_v0  ;;  %v2657_v8 = vunpack.i.h.bf16 %v2655_v47  ;;  %v2656_v54 = vunpack.i.l.bf16 %v2655_v47  ;;  %v883_v51 = vmul.bf16 %v3885_v11, %v860_v33 }
 0x100   :  { %1639 = vst [vmem:[#allocation2 + $0x88] sm:$0x33] %v2364_v50  ;;  %v884_v63 = vmul.bf16 %v3322_v20, %v861_v44  ;;  %v1875_v52 = vsel %vm935_vm3, %v2661_v7, %v2662_v26  ;;  %v1876_v39 = vsel %vm935_vm3, %v2662_v26, %v2661_v7  ;;  %v2672_v12 = vunpack.i.h.bf16 %v2670_v42 }
 0x101   :  { %v2312_v46 = vcombine.low %v962_v29, %v963_v45  ;;  %v1878_v16 = vpack.c.bf16 %v1875_v52, %v1875_v52  ;;  %v1879_v43 = vpack.c.bf16 %v1876_v39, %v1876_v39  ;;  %v1798_v40 = vsel %vm856_vm4, %v2656_v54, %v2657_v8  ;;  %v2685_v39 = vpop.permute.xlu0 %2684 }
 0x102   :  { %v2306_v38 = vcombine.low %v883_v51, %v884_v63  ;;  %v1799_v47 = vsel %vm856_vm4, %v2657_v8, %v2656_v54  ;;  %v1801_v9 = vpack.c.bf16 %v1798_v40, %v1798_v40  ;;  %v2812_v20 = vld [vmem:[#allocation2 + $0x84] ss:$16 sps:$4 sm:$0xff]   ;;  %v2814_v62 = vld [vmem:[#allocation2 + $0x80] ss:$16 sps:$4 sm:$0xff]   ;;  %vm976_vm7 = vcmp.lt.s32.totalorder %v3273_v27, 94 }
 0x103   :  { %v969_v4 = vrot.slane %v2312_v46, 6  ;;  %v1901_v22 = vmul.bf16 %v3326_v37, %v1878_v16  ;;  %v1902_v30 = vmul.bf16 %v3329_v36, %v1879_v43  ;;  %v1802_v60 = vpack.c.bf16 %v1799_v47, %v1799_v47  ;;  %2130 = vmatprep.subr.bf16.mxu0 %v2812_v20 }
 0x104   :  { %v890_v13 = vrot.slane %v2306_v38, 6  ;;  %v1824_v59 = vmul.bf16 %v3332_v3, %v1801_v9  ;;  %v2671_v6 = vunpack.i.l.bf16 %v2670_v42  ;;  %v2667_v49 = vunpack.i.h.bf16 %v2665_v18  ;;  %2131 = vmatpush1.bf16.msra.mxu0 %v2814_v62  ;;  %v3886_v62 = vld [vmem:[#allocation12_spill] sm:$0xff] }
 0x105   :  { %971 = vst [vmem:[#allocation2 + $0xb0] sm:$0xcc] %v969_v4  ;;  %v2385_v14 = vcombine.low %v1901_v22, %v1902_v30  ;;  %v1825_v31 = vmul.bf16 %v3340_v21, %v1802_v60  ;;  %v2666_v24 = vunpack.i.l.bf16 %v2665_v18  ;;  %v2682_v26 = vunpack.i.h.bf16 %v2680_v15  ;;  %v2690_v18 = vpop.permute.xlu1 %2689  ;;  %v3887_v4 = vld [vmem:[#allocation63_spill] sm:$0xff]  ;;  %v2204_v60 = vld [vmem:[%s3774_s2] sm:$0xf] }
 0x106   :  { %892 = vst [vmem:[#allocation2 + $0xa0] sm:$0xcc] %v890_v13  ;;  %v898_v37 = vsel %vm897_vm5, %v2671_v6, %v2672_v12  ;;  %v899_v36 = vsel %vm897_vm5, %v2672_v12, %v2671_v6  ;;  %v2681_v17 = vunpack.i.l.bf16 %v2680_v15  ;;  %v2677_v32 = vunpack.i.h.bf16 %v2675_v55 }
 0x107   :  { %v1908_v3 = vrot.slane %v2385_v14, 6  ;;  %v2379_v48 = vcombine.low %v1824_v59, %v1825_v31  ;;  %v901_v35 = vpack.c.bf16 %v898_v37, %v898_v37  ;;  %v902_v56 = vpack.c.bf16 %v899_v36, %v899_v36  ;;  %v2819_v42 = vld [vmem:[#allocation2 + $0x8c] ss:$16 sps:$4 sm:$0xff]   ;;  %v2821_v19 = vld [vmem:[#allocation2 + $0x88] ss:$16 sps:$4 sm:$0xff]  }
 0x108   :  { %v819_v21 = vsel %vm818_vm6, %v2666_v24, %v2667_v49  ;;  %v820_v0 = vsel %vm818_vm6, %v2667_v49, %v2666_v24  ;;  %v1838_v41 = vsel %vm897_vm5, %v2681_v17, %v2682_v26  ;;  %v1839_v25 = vsel %vm897_vm5, %v2682_v26, %v2681_v17  ;;  %2171 = vmatprep.subr.bf16.mxu1 %v2819_v42  ;;  %v3890_v31 = vld [vmem:[#allocation65_spill] sm:$0xff] }
 0x109   :  { %1910 = vst [vmem:[#allocation2 + $0xb8] sm:$0xcc] %v1908_v3  ;;  %v1831_v50 = vrot.slane %v2379_v48, 6  ;;  %v922_v33 = vmul.bf16 %v3335_v53, %v901_v35  ;;  %v923_v44 = vmul.bf16 %v3343_v58, %v902_v56  ;;  %v822_v7 = vpack.c.bf16 %v819_v21, %v819_v21  ;;  %2172 = vmatpush1.bf16.msra.mxu1 %v2821_v19 }
 0x10a   :  { %v823_v61 = vpack.c.bf16 %v820_v0, %v820_v0  ;;  %v1841_v29 = vpack.c.bf16 %v1838_v41, %v1838_v41  ;;  %v1842_v10 = vpack.c.bf16 %v1839_v25, %v1839_v25  ;;  %v2676_v45 = vunpack.i.l.bf16 %v2675_v55  ;;  %v3889_v55 = vld [vmem:[#allocation64_spill] sm:$0xff]  ;;  %v1948_v41 = vld [vmem:[%s3773_s1] sm:$0x3]  ;;  %s2876_s1 = scalar_lea.vmem %s2231_s15, 256 }
 0x10b   :  { %1833 = vst [vmem:[#allocation2 + $0xa8] sm:$0xcc] %v1831_v50  ;;  %v2309_v8 = vcombine.low %v922_v33, %v923_v44  ;;  %v843_v54 = vmul.bf16 %v3346_v23, %v822_v7  ;;  %v2692_v11 = vunpack.i.h.bf16 %v2690_v18  ;;  %v2691_v51 = vunpack.i.l.bf16 %v2690_v18  ;;  %p2877_p2 = scmp.ne.s32.totalorder %s2231_s15, %s2876_s1  ;;  %p2882_p4 = scmp.lt.s32.totalorder %s2876_s1, %s2876_s1 }
 0x10c   :  { %v844_v63 = vmul.bf16 %v3349_v57, %v823_v61  ;;  %v1862_v52 = vmul.bf16 %v3353_v1, %v1841_v29  ;;  %v1863_v53 = vmul.bf16 %v3356_v2, %v1842_v10  ;;  %v1761_v58 = vsel %vm818_vm6, %v2676_v45, %v2677_v32 }
 0x10d   :  { %930 = vst [vmem:[#allocation2 + $0xb0] sm:$0x33] %v2309_v8  ;;  %v1762_v46 = vsel %vm818_vm6, %v2677_v32, %v2676_v45  ;;  %v1764_v16 = vpack.c.bf16 %v1761_v58, %v1761_v58  ;;  %v1915_v23 = vsel %vm976_vm7, %v2691_v51, %v2692_v11  ;;  %v1916_v43 = vsel %vm976_vm7, %v2692_v11, %v2691_v51  ;;  %p2883_p5 = por %p2882_p4, %p2881_p3 }
 0x10e   :  { %v2303_v57 = vcombine.low %v843_v54, %v844_v63  ;;  %v2382_v40 = vcombine.low %v1862_v52, %v1863_v53  ;;  %v1765_v1 = vpack.c.bf16 %v1762_v46, %v1762_v46  ;;  %v1918_v38 = vpack.c.bf16 %v1915_v23, %v1915_v23 }
 0x10f   :  { %v1785_v2 = vmul.bf16 %v3359_v34, %v1764_v16  ;;  %v1919_v47 = vpack.c.bf16 %v1916_v43, %v1916_v43  ;;  %v2687_v9 = vunpack.i.h.bf16 %v2685_v39  ;;  %v2686_v12 = vunpack.i.l.bf16 %v2685_v39  ;;  %p2884_p6 = pnand %p2883_p5, %p2877_p2 }
 0x110   :  { %851 = vst [vmem:[#allocation2 + $0xa0] sm:$0x33] %v2303_v57  ;;  %1870 = vst [vmem:[#allocation2 + $0xb8] sm:$0x33] %v2382_v40  ;;  %v1786_v15 = vmul.bf16 %v3362_v28, %v1765_v1  ;;  %v1939_v20 = vmul.bf16 %v3365_v5, %v1918_v38  ;;  %v3888_v22 = vpack.i.b16 %v3887_v4, %v3887_v4  ;;  %v2932_v28 = vmov 0  }
 0x111   :  { %v1940_v34 = vmul.bf16 %v3889_v55, %v1919_v47  ;;  %v977_v13 = vsel %vm976_vm7, %v2686_v12, %v2687_v9  ;;  %v978_v59 = vsel %vm976_vm7, %v2687_v9, %v2686_v12  ;;  %2154 = vmatprep.mubr.bf16.mxu0 %v2932_v28  ;;  %2195 = vmatprep.mubr.bf16.mxu1 %v2932_v28  ;;  %vm2109_vm8 = vcmask 1041408  }
 0x112   :  { %v1000_v30 = vrot.slane %v3888_v22, %v3886_v62  ;;  %v2376_v5 = vcombine.low %v1785_v2, %v1786_v15  ;;  %v980_v6 = vpack.c.bf16 %v977_v13, %v977_v13  ;;  %v981_v49 = vpack.c.bf16 %v978_v59, %v978_v59  ;;  %2693 = vset.pattern.permute.xlu0 %v2932_v28 }
 0x113   :  { %v2388_v14 = vcombine.low %v1939_v20, %v1940_v34  ;;  %2207 = vperm.xlu0 %2693, %v2204_v60   ;;  %vm2105_vm9 = vcmask 818176  }
 0x114   :  { %1793 = vst [vmem:[#allocation2 + $0xa8] sm:$0x33] %v2376_v5  ;;  %v1001_v24 = vmul.bf16 %v3890_v31, %v980_v6  ;;  %v1002_v26 = vmul.bf16 %v1000_v30, %v981_v49 }
 0x115   :  { %1947 = vst [vmem:[#allocation2 + $0xc8] sm:$0x33] %v2388_v14 }
 0x116   :  { %v2315_v37 = vcombine.low %v1001_v24, %v1002_v26 }
 0x117   :  { %v2822_v36 = vld [vmem:[#allocation2 + $0xa4] ss:$16 sps:$4 sm:$0xff]   ;;  %v2824_v17 = vld [vmem:[#allocation2 + $0xa0] ss:$16 sps:$4 sm:$0xff]  }
 0x118   :  { %1009 = vst [vmem:[#allocation2 + $0xc0] sm:$0x33] %v2315_v37  ;;  %2132 = vmatprep.subr.bf16.mxu0 %v2822_v36 }
 0x119   :  { %2133 = vmatpush1.bf16.msra.mxu0 %v2824_v17 }
 0x11b   :  { %v2825_v27 = vld [vmem:[#allocation2 + $0xac] ss:$16 sps:$4 sm:$0xff]   ;;  %v2827_v32 = vld [vmem:[#allocation2 + $0xa8] ss:$16 sps:$4 sm:$0xff]  }
 0x11c   :  { %v1974_v3 = vld [vmem:[#allocation2 + $0xc8] sm:$0x33]  ;;  %2173 = vmatprep.subr.bf16.mxu1 %v2825_v27 }
 0x11d   :  { %v2416_v48 = vcombine.high %v1974_v3, %v1974_v3  ;;  %v2415_v35 = vcombine.low %v1974_v3, %v1974_v3  ;;  %2174 = vmatpush1.bf16.msra.mxu1 %v2827_v32 }
 0x11f   :  { %v1973_v56 = vld [vmem:[#allocation2 + $0xc0] sm:$0x33]  ;;  %2419 = vmatprep.subr.msk.bf16.mxu1 %vm2109_vm8, %v2416_v48  ;;  %v2117_v42 = vsel %vm2109_vm8, %v2415_v35, 0 }
 0x120   :  { %v2414_v19 = vcombine.high %v1973_v56, %v1973_v56  ;;  %v2413_v21 = vcombine.low %v1973_v56, %v1973_v56 }
 0x121   :  { %2176 = vmatpush1.bf16.msra.mxu1 %v2117_v42 }
 0x122   :  { %2417 = vmatprep.subr.msk.bf16.mxu0 %vm2109_vm8, %v2414_v19  ;;  %v2111_v0 = vsel %vm2109_vm8, %v2413_v21, 0 }
 0x123   :  { %2135 = vmatpush1.bf16.msra.mxu0 %v2111_v0 }
 0x124   :  { %2420 = vmatmul.mubr.msk.bf16.vlgmr.msra.gmra.mrb[0].mxu1 %vm2105_vm9, %v1948_v41 }
 0x126   :  { %2418 = vmatmul.mubr.msk.bf16.vlgmr.msra.gmra.mrb[0].mxu0 %vm2105_vm9, %v1948_v41 }
 0x192   :  { %v2208_v25 = vpop.permute.xlu0 %2207 }
 0x1f7   :  { %v2197_v18 = vpop.f32.mrb[0].mxu1 }
 0x1f8   :  { %v2217_v33 = vadd.f32 %v2208_v25, %v2197_v18  ;;  %v2199_v44 = vpop.f32.mrb[1].mxu1 }
 0x1f9   :  { %v2156_v50 = vpop.f32.mrb[0].mxu0  ;;  %v2218_v29 = vadd.f32 %v2208_v25, %v2199_v44  ;;  %v2201_v10 = vpop.f32.mrb[2].mxu1 }
 0x1fa   :  { %v2210_v7 = vadd.f32 %v2208_v25, %v2156_v50  ;;  %v2158_v61 = vpop.f32.mrb[1].mxu0  ;;  %v2202_v54 = vpop.f32.mrb[3].mxu1 }
 0x1fb   :  { %v2211_v45 = vadd.f32 %v2208_v25, %v2158_v61  ;;  %v2160_v8 = vpop.f32.mrb[2].mxu0  ;;  %v2221_v11 = vcombine.low %v2217_v33, %v2218_v29 }
 0x1fc   :  { %v2161_v51 = vpop.f32.mrb[3].mxu0 }
 0x1fd   :  { %v2214_v63 = vcombine.low %v2210_v7, %v2211_v45  ;;  %2224 = vst [vmem:[#allocation8 + $0x8] sm:$0xff] %v2221_v11 }
 0x1ff   :  { %2216 = vst [vmem:[#allocation8] sm:$0xff] %v2214_v63 }
 0x200   :  { %2887 = shalt.err (!%p2884_p6)
}
 0x201   :  { %s2888_s18 = scalar_lea.hbm %s3776_s4, 256 }
 0x202   :  { %p2889_p7 = scmp.ne.s32.totalorder %s3776_s4, %s2888_s18  ;;  %p2892_p8 = scmp.lt.u32.totalorder %s2888_s18, %s3776_s4 }
 0x204   :  { %p2894_p9 = pnand %p2892_p8, %p2889_p7 }
 0x206   :  { %2897 = shalt.err (!%p2894_p9)
}
 0x207   :  { %2236 = dma.vmem_to_hbm [thread:$0]  %s2231_s15, 256, %s3776_s4, [#allocation5], %s2905_s25, %s2905_s25, %s2906_s26  }
 0x208   :  { %2902 = dma.done.wait [#allocation5], 256  }
 0x209   :  { %2903 = vsyncadd [#allocation5], 4294967040 }
 0x20a   :  { %2240 = vsyncpa [#allocation4], 1 }
 0x20b   :  { %2241 = vsyncpa [#allocation7], 1 }
 0x20c   :  { %2242 = vsyncpa [#allocation5], 1 }

</bundles_post_ra>
